<compile_context>
chip_gen: v7x
topology: tpu7x:2x2x1
jax: 0.10.0
libtpu: 0.0.40
codegen_flags: <defaults>
</compile_context>

<pallas_src>
import jax
import jax.numpy as jnp
from jax import lax
from jax.experimental import pallas as pl
from jax.experimental.pallas import tpu as pltpu


# --------------------------------------------------------------------------- #
# Kernels
# --------------------------------------------------------------------------- #
def _proj_kernel(x_ref, wq_ref, bq_ref, wk_ref, bk_ref, wv_ref, bv_ref,
                 q_ref, k_ref, v_ref):
    """Project one pixel tile: q/k -> (C8, tp), v_aug -> (C+8, tp), all bf16."""
    x = x_ref[0].astype(jnp.bfloat16)                       # (C, tp)
    tp = x_ref.shape[2]

    def proj(w_ref, b_ref):
        y = lax.dot_general(w_ref[...], x, (((1,), (0,)), ((), ())),
                            preferred_element_type=jnp.float32)
        return (y + b_ref[...]).astype(jnp.bfloat16)

    q_ref[0] = proj(wq_ref, bq_ref)                         # (C8, tp)
    k_ref[0] = proj(wk_ref, bk_ref)                         # (C8, tp)
    # v is augmented with 8 extra rows; row C is all ones so the PV matmul in
    # the attention kernel also produces the softmax denominator on the MXU.
    row = lax.broadcasted_iota(jnp.int32, (8, tp), 0)
    tail = jnp.where(row == 0, 1.0, 0.0).astype(jnp.bfloat16)
    v_ref[0] = jnp.concatenate([proj(wv_ref, bv_ref), tail], axis=0)


def _attn_kernel(x_ref, q_ref, k_ref, v_ref, gamma_ref, out_ref,
                 m_scr, acc_scr):
    """One (batch, q-tile, kv-tile) step of flash-style attention.

      x_ref  : (1, C, tq)    f32   residual input
      q_ref  : (1, C8, tq)   bf16  projected queries
      k_ref  : (1, C8, tk)   bf16  projected keys
      v_ref  : (1, C+8, tk)  bf16  projected values + ones row at index C
      m_scr  : (1, tq)       f32   running max
      acc_scr: (C+8, tq)     f32   running unnormalized output; row C = l
    """
    ki = pl.program_id(2)
    nk = pl.num_programs(2)
    C = out_ref.shape[1]

    @pl.when(ki == 0)
    def _init():
        m_scr[...] = jnp.full_like(m_scr, -jnp.inf)
        acc_scr[...] = jnp.zeros_like(acc_scr)

    q = q_ref[0]                                            # (C8, tq)  bf16
    k = k_ref[0]                                            # (C8, tk)  bf16
    v = v_ref[0]                                            # (C+8, tk) bf16

    # scores_t[j, i] = <k_j, q_i>  (keys on sublanes, queries on lanes).
    scores_t = lax.dot_general(k, q, (((0,), (0,)), ((), ())),
                               preferred_element_type=jnp.float32)  # (tk, tq)

    m_prev = m_scr[...]                                     # (1, tq)
    m_new = jnp.maximum(m_prev, jnp.max(scores_t, axis=0, keepdims=True))
    alpha = jnp.exp(m_prev - m_new)                         # (1, tq)
    p_t = jnp.exp(scores_t - m_new).astype(jnp.bfloat16)    # (tk, tq)  bf16

    # acc[c, i] = alpha * acc + sum_j v_aug[c, j] * p_t[j, i]; row C accumulates
    # sum_j p (the softmax denominator), courtesy of the ones row in v_aug.
    acc_scr[...] = alpha * acc_scr[...] + lax.dot_general(
        v, p_t, (((1,), (0,)), ((), ())), preferred_element_type=jnp.float32)
    m_scr[...] = m_new

    @pl.when(ki == nk - 1)
    def _finalize():
        num = acc_scr[pl.ds(0, C), :]                       # (C, tq)
        denom = acc_scr[pl.ds(C, 1), :]                     # (1, tq)
        out = num * pl.reciprocal(denom, approx=False)      # exact; once per q-tile
        gamma = gamma_ref[0]
        out_ref[0] = (x_ref[0] + gamma * out).astype(out_ref.dtype)


# --------------------------------------------------------------------------- #
# Tiling helpers
# --------------------------------------------------------------------------- #
def _pick_tile(hw, candidates):
    for t in candidates:
        if t <= hw and hw % t == 0:
            return t
    return hw


def _pick_tile_q(hw, batch):
    # Large q tiles cut kv re-streaming (HBM traffic ~ 1/tq) and grid overhead,
    # but keep >= 2 parallel programs so both v7x TensorCores stay busy.
    for t in (2048, 1024, 512, 256, 128):
        if t <= hw and hw % t == 0 and batch * (hw // t) >= 2:
            return t
    return hw


# --------------------------------------------------------------------------- #
# Wrapper
# --------------------------------------------------------------------------- #
def bidirectional_attention(x_nchw, temb, params):
    """x_nchw: (B, C, H, W) f32; temb is unused (matches the PyTorch forward).

    Returns (out_low2high, out_high2low); the two directions of the original
    module share weights and inputs, so the outputs are identical.
    """
    del temb  # unused by the reference forward
    B, C, H, W = x_nchw.shape
    assert C % 8 == 0, "channels must be a multiple of 8"
    HW = H * W
    C8 = C // 8
    C_aug = C + 8  # 8 extra sublanes on v: row C is ones (denominator), rest 0

    x_pix = x_nchw.reshape(B, C, HW).astype(jnp.float32)    # reshape only, no transpose

    # Pre-cast MXU weight operands to bf16 once in the wrapper; biases stay f32.
    wq = params["wq"].astype(jnp.bfloat16)
    wk = params["wk"].astype(jnp.bfloat16)
    wv = params["wv"].astype(jnp.bfloat16)
    bq, bk, bv = params["bq"], params["bk"], params["bv"]
    gamma = params["gamma"].astype(jnp.float32).reshape(1)

    tp = _pick_tile(HW, (1024, 512, 256, 128))   # projection pixel tile
    tq = _pick_tile_q(HW, B)                     # query tile (large)
    tk = _pick_tile(HW, (256, 512, 128))         # kv tile (v5e-friendly 256 first)

    # ---- 1) Hoisted projections: q, k, v_aug computed exactly once ---------
    q, k, v_aug = pl.pallas_call(
        _proj_kernel,
        grid=(B, HW // tp),
        in_specs=[
            pl.BlockSpec((1, C, tp), lambda b, p: (b, 0, p)),
            pl.BlockSpec((C8, C), lambda b, p: (0, 0)),
            pl.BlockSpec((C8, 1), lambda b, p: (0, 0)),
            pl.BlockSpec((C8, C), lambda b, p: (0, 0)),
            pl.BlockSpec((C8, 1), lambda b, p: (0, 0)),
            pl.BlockSpec((C, C), lambda b, p: (0, 0)),
            pl.BlockSpec((C, 1), lambda b, p: (0, 0)),
        ],
        out_specs=(
            pl.BlockSpec((1, C8, tp), lambda b, p: (b, 0, p)),
            pl.BlockSpec((1, C8, tp), lambda b, p: (b, 0, p)),
            pl.BlockSpec((1, C_aug, tp), lambda b, p: (b, 0, p)),
        ),
        out_shape=(
            jax.ShapeDtypeStruct((B, C8, HW), jnp.bfloat16),
            jax.ShapeDtypeStruct((B, C8, HW), jnp.bfloat16),
            jax.ShapeDtypeStruct((B, C_aug, HW), jnp.bfloat16),
        ),
        compiler_params=pltpu.CompilerParams(
            dimension_semantics=("parallel", "parallel")),
    )(x_pix, wq, bq, wk, bk, wv, bv)

    # ---- 2) Flash-style attention + residual -------------------------------
    # VMEM budget from the real tile footprint (double-buffered blocks +
    # scratch + score working set), capped well below the 64 MiB v7x VMEM.
    f32b, bf16b = 4, 2
    block_bytes = 2 * (f32b * C * tq + bf16b * C8 * tq +
                       bf16b * C8 * tk + bf16b * C_aug * tk +
                       f32b * C * tq)
    scratch_bytes = f32b * (tq + C_aug * tq)
    work_bytes = (f32b + bf16b) * tk * tq + 8 * f32b * tq
    vmem_limit = int(min(48 * 1024 * 1024,
                         max(8 * 1024 * 1024,
                             2 * (block_bytes + scratch_bytes + work_bytes))))

    out = pl.pallas_call(
        _attn_kernel,
        grid=(B, HW // tq, HW // tk),
        in_specs=[
            pl.BlockSpec((1, C, tq), lambda b, qi, ki: (b, 0, qi)),      # x (residual)
            pl.BlockSpec((1, C8, tq), lambda b, qi, ki: (b, 0, qi)),     # q
            pl.BlockSpec((1, C8, tk), lambda b, qi, ki: (b, 0, ki)),     # k
            pl.BlockSpec((1, C_aug, tk), lambda b, qi, ki: (b, 0, ki)),  # v_aug
            pl.BlockSpec(memory_space=pltpu.MemorySpace.SMEM),           # gamma
        ],
        out_specs=pl.BlockSpec((1, C, tq), lambda b, qi, ki: (b, 0, qi)),
        out_shape=jax.ShapeDtypeStruct((B, C, HW), jnp.float32),
        scratch_shapes=[
            pltpu.VMEM((1, tq), jnp.float32),       # running max
            pltpu.VMEM((C_aug, tq), jnp.float32),   # unnormalized out; row C = l
        ],
        compiler_params=pltpu.CompilerParams(
            dimension_semantics=("parallel", "parallel", "arbitrary"),
            vmem_limit_bytes=vmem_limit),
    )(x_pix, q, k, v_aug, gamma)

    out = out.reshape(B, C, H, W)
    # Both directions share weights/inputs in the original module -> identical.
    return out, out


# --------------------------------------------------------------------------- #
# Pure-JAX reference (mirrors the PyTorch forward)
# --------------------------------------------------------------------------- #
def _reference(x_nchw, params, matmul_dtype=jnp.float32):
    """`matmul_dtype=jnp.bfloat16` mirrors the kernel's bf16-operand /
    f32-accumulate matmuls for a tight comparison; f32 is PyTorch-exact."""
    B, C, H, W = x_nchw.shape
    HW = H * W
    md = matmul_dtype
    x_pix = x_nchw.reshape(B, C, HW).astype(jnp.float32)
    wq, bq = params["wq"], params["bq"]
    wk, bk = params["wk"], params["bk"]
    wv, bv = params["wv"], params["bv"]
    gamma = params["gamma"][0]

    def proj(w, b):
        y = jnp.einsum("oc,bcp->bop", w.astype(md), x_pix.astype(md),
                       preferred_element_type=jnp.float32) + b[None, :, :]
        return y.astype(md)

    q = proj(wq, bq)                                        # (B, C8, HW)
    k = proj(wk, bk)                                        # (B, C8, HW)
    v = proj(wv, bv)                                        # (B, C,  HW)
    scores = jnp.einsum("bci,bcj->bij", q, k,
                        preferred_element_type=jnp.float32)  # (B, HW, HW)
    attn = jax.nn.softmax(scores, axis=-1)
    out = jnp.einsum("bij,bcj->bci", attn.astype(md), v,
                     preferred_element_type=jnp.float32)     # (B, C, HW)
    res = (x_pix + gamma * out).reshape(B, C, H, W)
    return res, res


def _init_params(key, channels):
    c8 = channels // 8
    ks = jax.random.split(key, 6)
    scale = 1.0 / jnp.sqrt(channels)
    return {
        # Conv2d 1x1 weights stored as (C_out, C_in) so proj = W @ x.
        "wq": jax.random.normal(ks[0], (c8, channels), jnp.float32) * scale,
        "bq": jax.random.normal(ks[1], (c8, 1), jnp.float32) * scale,
        "wk": jax.random.normal(ks[2], (c8, channels), jnp.float32) * scale,
        "bk": jax.random.normal(ks[3], (c8, 1), jnp.float32) * scale,
        "wv": jax.random.normal(ks[4], (channels, channels), jnp.float32) * scale,
        "bv": jax.random.normal(ks[5], (channels, 1), jnp.float32) * scale,
        # PyTorch inits gamma to 0 (output would trivially equal x);
        # use a nonzero value to actually exercise the attention path.
        "gamma": jnp.full((1,), 0.5, jnp.float32),
    }


if __name__ == "__main__":
    key = jax.random.PRNGKey(0)
    kx, kp = jax.random.split(key)

    B, C, H, W = 2, 32, 16, 16            # channels=32 -> C//8 = 4, HW = 256
    x = jax.random.normal(kx, (B, C, H, W), jnp.float32)
    temb = jax.random.normal(jax.random.PRNGKey(1), (B, 16), jnp.float32)  # unused, as in PyTorch

    params = _init_params(kp, C)

    fwd = jax.jit(bidirectional_attention)
    out_lh, out_hl = fwd(x, temb, params)
    jax.block_until_ready((out_lh, out_hl))

    # Tight check against a reference using matching bf16-operand matmuls.
    ref_lh_m, ref_hl_m = _reference(x, params, matmul_dtype=jnp.bfloat16)
    assert jnp.allclose(out_lh, ref_lh_m, atol=2e-2, rtol=2e-2)
    assert jnp.allclose(out_hl, ref_hl_m, atol=2e-2, rtol=2e-2)

    # Looser sanity check against the full-f32 PyTorch-equivalent reference.
    ref_lh_f, _ = _reference(x, params, matmul_dtype=jnp.float32)
    assert jnp.allclose(out_lh, ref_lh_f, atol=1e-1, rtol=1e-1)

    print("KERNEL_OK")
</pallas_src>

<mosaic_0001>
module attributes {stable_mosaic.version = 11 : i64} {
  func.func @_attn_kernel(%arg0: i32, %arg1: i32, %arg2: i32, %arg3: memref<1x32x256xf32, #tpu.memory_space<vmem>>, %arg4: memref<1x4x256xbf16, #tpu.memory_space<vmem>>, %arg5: memref<1x4x256xbf16, #tpu.memory_space<vmem>>, %arg6: memref<1x40x256xbf16, #tpu.memory_space<vmem>>, %arg7: memref<1xf32, #tpu.memory_space<smem>>, %arg8: memref<1x32x256xf32, #tpu.memory_space<vmem>>, %arg9: memref<1x256xf32, #tpu.memory_space<vmem>>, %arg10: memref<40x256xf32, #tpu.memory_space<vmem>>) attributes {dimension_semantics = [#tpu.dimension_semantics<parallel>, #tpu.dimension_semantics<parallel>, #tpu.dimension_semantics<arbitrary>], iteration_bounds = array<i64: 2, 1, 1>, scalar_prefetch = 0 : i64, scratch_operands = 2 : i64, tpu.core_type = #tpu.core_type<tc>, window_params = [{transform_indices = @transform_0, window_bounds = array<i64: 1, 32, 256>}, {transform_indices = @transform_1, window_bounds = array<i64: 1, 4, 256>}, {transform_indices = @transform_2, window_bounds = array<i64: 1, 4, 256>}, {transform_indices = @transform_3, window_bounds = array<i64: 1, 40, 256>}, {transform_indices = @transform_4, window_bounds = array<i64: 1>}, {transform_indices = @transform_5, window_bounds = array<i64: 1, 32, 256>}]} {
    %c0_i32 = arith.constant 0 : i32
    %0 = arith.cmpi eq, %arg2, %c0_i32 : i32
    %1 = arith.extui %0 : i1 to i32
    %c0_i32_0 = arith.constant 0 : i32
    %2 = arith.cmpi ne, %1, %c0_i32_0 : i32
    scf.if %2 {
      %cst_21 = arith.constant 0xFF800000 : f32
      %30 = vector.broadcast %cst_21 : f32 to vector<1x256xf32>
      %c0_22 = arith.constant 0 : index
      %c0_23 = arith.constant 0 : index
      %31 = vector.load %arg9[%c0_22, %c0_23] : memref<1x256xf32, #tpu.memory_space<vmem>>, vector<1x256xf32>
      tpu.vector_store %arg9[%c0_22, %c0_23], %30 {strides = array<i32>} : memref<1x256xf32, #tpu.memory_space<vmem>>, vector<1x256xf32>,
      %cst_24 = arith.constant 0.000000e+00 : f32
      %32 = vector.broadcast %cst_24 : f32 to vector<40x256xf32>
      %c0_25 = arith.constant 0 : index
      %c0_26 = arith.constant 0 : index
      %33 = vector.load %arg10[%c0_25, %c0_26] : memref<40x256xf32, #tpu.memory_space<vmem>>, vector<40x256xf32>
      tpu.vector_store %arg10[%c0_25, %c0_26], %32 {strides = array<i32>} : memref<40x256xf32, #tpu.memory_space<vmem>>, vector<40x256xf32>,
    } else {
    }
    %c0 = arith.constant 0 : index
    %c0_1 = arith.constant 0 : index
    %c0_2 = arith.constant 0 : index
    %3 = vector.load %arg4[%c0, %c0_1, %c0_2] : memref<1x4x256xbf16, #tpu.memory_space<vmem>>, vector<1x4x256xbf16>
    %4 = vector.shape_cast %3 : vector<1x4x256xbf16> to vector<4x256xbf16>
    %c0_3 = arith.constant 0 : index
    %c0_4 = arith.constant 0 : index
    %c0_5 = arith.constant 0 : index
    %5 = vector.load %arg5[%c0_3, %c0_4, %c0_5] : memref<1x4x256xbf16, #tpu.memory_space<vmem>>, vector<1x4x256xbf16>
    %6 = vector.shape_cast %5 : vector<1x4x256xbf16> to vector<4x256xbf16>
    %c0_6 = arith.constant 0 : index
    %c0_7 = arith.constant 0 : index
    %c0_8 = arith.constant 0 : index
    %7 = vector.load %arg6[%c0_6, %c0_7, %c0_8] : memref<1x40x256xbf16, #tpu.memory_space<vmem>>, vector<1x40x256xbf16>
    %8 = vector.shape_cast %7 : vector<1x40x256xbf16> to vector<40x256xbf16>
    %cst = arith.constant dense<0.000000e+00> : vector<256x256xf32>
    %9 = tpu.matmul %6, %4, %cst {dimension_numbers = #tpu.dot_dimension_numbers<[0], [0], [1], [1], [0, 1, 1, 1], [], []>} : vector<4x256xbf16>, vector<4x256xbf16>, vector<256x256xf32> -> vector<256x256xf32>
    %c0_9 = arith.constant 0 : index
    %c0_10 = arith.constant 0 : index
    %10 = vector.load %arg9[%c0_9, %c0_10] : memref<1x256xf32, #tpu.memory_space<vmem>>, vector<1x256xf32>
    %cst_11 = arith.constant dense<0xFF800000> : vector<256xf32>
    %11 = vector.multi_reduction <maximumf>, %9, %cst_11 [0] : vector<256x256xf32> to vector<256xf32>
    %12 = vector.shape_cast %11 : vector<256xf32> to vector<1x256xf32>
    %13 = arith.maximumf %10, %12 : vector<1x256xf32>
    %14 = arith.subf %10, %13 : vector<1x256xf32>
    %15 = math.exp %14 : vector<1x256xf32>
    %16 = vector.broadcast %13 : vector<1x256xf32> to vector<256x256xf32>
    %17 = arith.subf %9, %16 : vector<256x256xf32>
    %18 = math.exp %17 : vector<256x256xf32>
    %19 = arith.truncf %18 : vector<256x256xf32> to vector<256x256xbf16>
    %c0_12 = arith.constant 0 : index
    %c0_13 = arith.constant 0 : index
    %20 = vector.load %arg10[%c0_12, %c0_13] : memref<40x256xf32, #tpu.memory_space<vmem>>, vector<40x256xf32>
    %21 = vector.broadcast %15 : vector<1x256xf32> to vector<40x256xf32>
    %22 = arith.mulf %21, %20 : vector<40x256xf32>
    %cst_14 = arith.constant dense<0.000000e+00> : vector<40x256xf32>
    %23 = tpu.matmul %8, %19, %cst_14 {dimension_numbers = #tpu.dot_dimension_numbers<[1], [0], [0], [1], [0, 0, 1, 1], [], []>} : vector<40x256xbf16>, vector<256x256xbf16>, vector<40x256xf32> -> vector<40x256xf32>
    %24 = arith.addf %22, %23 : vector<40x256xf32>
    %c0_15 = arith.constant 0 : index
    %c0_16 = arith.constant 0 : index
    %25 = vector.load %arg10[%c0_15, %c0_16] : memref<40x256xf32, #tpu.memory_space<vmem>>, vector<40x256xf32>
    tpu.vector_store %arg10[%c0_15, %c0_16], %24 {strides = array<i32>} : memref<40x256xf32, #tpu.memory_space<vmem>>, vector<40x256xf32>,
    %c0_17 = arith.constant 0 : index
    %c0_18 = arith.constant 0 : index
    %26 = vector.load %arg9[%c0_17, %c0_18] : memref<1x256xf32, #tpu.memory_space<vmem>>, vector<1x256xf32>
    tpu.vector_store %arg9[%c0_17, %c0_18], %13 {strides = array<i32>} : memref<1x256xf32, #tpu.memory_space<vmem>>, vector<1x256xf32>,
    %c0_i32_19 = arith.constant 0 : i32
    %27 = arith.cmpi eq, %arg2, %c0_i32_19 : i32
    %28 = arith.extui %27 : i1 to i32
    %c0_i32_20 = arith.constant 0 : i32
    %29 = arith.cmpi ne, %28, %c0_i32_20 : i32
    scf.if %29 {
      %c0_21 = arith.constant 0 : index
      %c0_22 = arith.constant 0 : index
      %30 = vector.load %arg10[%c0_21, %c0_22] : memref<40x256xf32, #tpu.memory_space<vmem>>, vector<32x256xf32>
      %c32 = arith.constant 32 : index
      %c0_23 = arith.constant 0 : index
      %31 = vector.load %arg10[%c32, %c0_23] : memref<40x256xf32, #tpu.memory_space<vmem>>, vector<1x256xf32>
      %32 = tpu.reciprocal %31 : vector<1x256xf32> -> vector<1x256xf32>
      %33 = vector.broadcast %32 : vector<1x256xf32> to vector<32x256xf32>
      %34 = arith.mulf %30, %33 : vector<32x256xf32>
      %c0_24 = arith.constant 0 : index
      %35 = memref.load %arg7[%c0_24] : memref<1xf32, #tpu.memory_space<smem>>
      %c0_25 = arith.constant 0 : index
      %c0_26 = arith.constant 0 : index
      %c0_27 = arith.constant 0 : index
      %36 = vector.load %arg3[%c0_25, %c0_26, %c0_27] : memref<1x32x256xf32, #tpu.memory_space<vmem>>, vector<1x32x256xf32>
      %37 = vector.shape_cast %36 : vector<1x32x256xf32> to vector<32x256xf32>
      %38 = vector.broadcast %35 : f32 to vector<32x256xf32>
      %39 = arith.mulf %38, %34 : vector<32x256xf32>
      %40 = arith.addf %37, %39 : vector<32x256xf32>
      %c0_28 = arith.constant 0 : index
      %c0_29 = arith.constant 0 : index
      %c0_30 = arith.constant 0 : index
      %41 = vector.load %arg8[%c0_28, %c0_29, %c0_30] : memref<1x32x256xf32, #tpu.memory_space<vmem>>, vector<1x32x256xf32>
      %42 = vector.shape_cast %41 : vector<1x32x256xf32> to vector<32x256xf32>
      %43 = vector.shape_cast %40 : vector<32x256xf32> to vector<1x32x256xf32>
      tpu.vector_store %arg8[%c0_28, %c0_29, %c0_30], %43 {strides = array<i32>} : memref<1x32x256xf32, #tpu.memory_space<vmem>>, vector<1x32x256xf32>,
    } else {
    }
    return
  }
  func.func @transform_0(%arg0: i32, %arg1: i32, %arg2: i32) -> (i32, i32, i32) {
    %c0_i32 = arith.constant 0 : i32
    %c0_i32_0 = arith.constant 0 : i32
    return %arg0, %c0_i32, %arg1 : i32, i32, i32
  }
  func.func @transform_1(%arg0: i32, %arg1: i32, %arg2: i32) -> (i32, i32, i32) {
    %c0_i32 = arith.constant 0 : i32
    %c0_i32_0 = arith.constant 0 : i32
    return %arg0, %c0_i32, %arg1 : i32, i32, i32
  }
  func.func @transform_2(%arg0: i32, %arg1: i32, %arg2: i32) -> (i32, i32, i32) {
    %c0_i32 = arith.constant 0 : i32
    %c0_i32_0 = arith.constant 0 : i32
    return %arg0, %c0_i32, %arg2 : i32, i32, i32
  }
  func.func @transform_3(%arg0: i32, %arg1: i32, %arg2: i32) -> (i32, i32, i32) {
    %c0_i32 = arith.constant 0 : i32
    %c0_i32_0 = arith.constant 0 : i32
    return %arg0, %c0_i32, %arg2 : i32, i32, i32
  }
  func.func @transform_4(%arg0: i32, %arg1: i32, %arg2: i32) -> i32 {
    %c0_i32 = arith.constant 0 : i32
    %c0_i32_0 = arith.constant 0 : i32
    return %c0_i32 : i32
  }
  func.func @transform_5(%arg0: i32, %arg1: i32, %arg2: i32) -> (i32, i32, i32) {
    %c0_i32 = arith.constant 0 : i32
    %c0_i32_0 = arith.constant 0 : i32
    return %arg0, %c0_i32, %arg1 : i32, i32, i32
  }
}

module attributes {stable_mosaic.version = 11 : i64} {
  func.func @_proj_kernel(%arg0: i32, %arg1: i32, %arg2: memref<1x32x256xf32, #tpu.memory_space<vmem>>, %arg3: memref<4x32xbf16, #tpu.memory_space<vmem>>, %arg4: memref<4x1xf32, #tpu.memory_space<vmem>>, %arg5: memref<4x32xbf16, #tpu.memory_space<vmem>>, %arg6: memref<4x1xf32, #tpu.memory_space<vmem>>, %arg7: memref<32x32xbf16, #tpu.memory_space<vmem>>, %arg8: memref<32x1xf32, #tpu.memory_space<vmem>>, %arg9: memref<1x4x256xbf16, #tpu.memory_space<vmem>>, %arg10: memref<1x4x256xbf16, #tpu.memory_space<vmem>>, %arg11: memref<1x40x256xbf16, #tpu.memory_space<vmem>>) attributes {dimension_semantics = [#tpu.dimension_semantics<parallel>, #tpu.dimension_semantics<parallel>], iteration_bounds = array<i64: 2, 1>, scalar_prefetch = 0 : i64, scratch_operands = 0 : i64, tpu.core_type = #tpu.core_type<tc>, window_params = [{transform_indices = @transform_0, window_bounds = array<i64: 1, 32, 256>}, {pipeline_mode = #tpu.pipeline_mode<synchronous>, transform_indices = @transform_1, window_bounds = array<i64: 4, 32>}, {pipeline_mode = #tpu.pipeline_mode<synchronous>, transform_indices = @transform_2, window_bounds = array<i64: 4, 1>}, {pipeline_mode = #tpu.pipeline_mode<synchronous>, transform_indices = @transform_3, window_bounds = array<i64: 4, 32>}, {pipeline_mode = #tpu.pipeline_mode<synchronous>, transform_indices = @transform_4, window_bounds = array<i64: 4, 1>}, {pipeline_mode = #tpu.pipeline_mode<synchronous>, transform_indices = @transform_5, window_bounds = array<i64: 32, 32>}, {pipeline_mode = #tpu.pipeline_mode<synchronous>, transform_indices = @transform_6, window_bounds = array<i64: 32, 1>}, {transform_indices = @transform_7, window_bounds = array<i64: 1, 4, 256>}, {transform_indices = @transform_8, window_bounds = array<i64: 1, 4, 256>}, {transform_indices = @transform_9, window_bounds = array<i64: 1, 40, 256>}]} {
    %c0 = arith.constant 0 : index
    %c0_0 = arith.constant 0 : index
    %c0_1 = arith.constant 0 : index
    %0 = vector.load %arg2[%c0, %c0_0, %c0_1] : memref<1x32x256xf32, #tpu.memory_space<vmem>>, vector<1x32x256xf32>
    %1 = vector.shape_cast %0 : vector<1x32x256xf32> to vector<32x256xf32>
    %2 = arith.truncf %1 : vector<32x256xf32> to vector<32x256xbf16>
    %c0_2 = arith.constant 0 : index
    %c0_3 = arith.constant 0 : index
    %3 = vector.load %arg3[%c0_2, %c0_3] : memref<4x32xbf16, #tpu.memory_space<vmem>>, vector<4x32xbf16>
    %cst = arith.constant dense<0.000000e+00> : vector<4x256xf32>
    %4 = tpu.matmul %3, %2, %cst {dimension_numbers = #tpu.dot_dimension_numbers<[1], [0], [0], [1], [0, 0, 1, 1], [], []>} : vector<4x32xbf16>, vector<32x256xbf16>, vector<4x256xf32> -> vector<4x256xf32>
    %c0_4 = arith.constant 0 : index
    %c0_5 = arith.constant 0 : index
    %5 = vector.load %arg4[%c0_4, %c0_5] : memref<4x1xf32, #tpu.memory_space<vmem>>, vector<4x1xf32>
    %6 = vector.broadcast %5 : vector<4x1xf32> to vector<4x256xf32>
    %7 = arith.addf %4, %6 : vector<4x256xf32>
    %8 = arith.truncf %7 : vector<4x256xf32> to vector<4x256xbf16>
    %c0_6 = arith.constant 0 : index
    %c0_7 = arith.constant 0 : index
    %c0_8 = arith.constant 0 : index
    %9 = vector.load %arg9[%c0_6, %c0_7, %c0_8] : memref<1x4x256xbf16, #tpu.memory_space<vmem>>, vector<1x4x256xbf16>
    %10 = vector.shape_cast %9 : vector<1x4x256xbf16> to vector<4x256xbf16>
    %11 = vector.shape_cast %8 : vector<4x256xbf16> to vector<1x4x256xbf16>
    tpu.vector_store %arg9[%c0_6, %c0_7, %c0_8], %11 {strides = array<i32>} : memref<1x4x256xbf16, #tpu.memory_space<vmem>>, vector<1x4x256xbf16>,
    %c0_9 = arith.constant 0 : index
    %c0_10 = arith.constant 0 : index
    %12 = vector.load %arg5[%c0_9, %c0_10] : memref<4x32xbf16, #tpu.memory_space<vmem>>, vector<4x32xbf16>
    %cst_11 = arith.constant dense<0.000000e+00> : vector<4x256xf32>
    %13 = tpu.matmul %12, %2, %cst_11 {dimension_numbers = #tpu.dot_dimension_numbers<[1], [0], [0], [1], [0, 0, 1, 1], [], []>} : vector<4x32xbf16>, vector<32x256xbf16>, vector<4x256xf32> -> vector<4x256xf32>
    %c0_12 = arith.constant 0 : index
    %c0_13 = arith.constant 0 : index
    %14 = vector.load %arg6[%c0_12, %c0_13] : memref<4x1xf32, #tpu.memory_space<vmem>>, vector<4x1xf32>
    %15 = vector.broadcast %14 : vector<4x1xf32> to vector<4x256xf32>
    %16 = arith.addf %13, %15 : vector<4x256xf32>
    %17 = arith.truncf %16 : vector<4x256xf32> to vector<4x256xbf16>
    %c0_14 = arith.constant 0 : index
    %c0_15 = arith.constant 0 : index
    %c0_16 = arith.constant 0 : index
    %18 = vector.load %arg10[%c0_14, %c0_15, %c0_16] : memref<1x4x256xbf16, #tpu.memory_space<vmem>>, vector<1x4x256xbf16>
    %19 = vector.shape_cast %18 : vector<1x4x256xbf16> to vector<4x256xbf16>
    %20 = vector.shape_cast %17 : vector<4x256xbf16> to vector<1x4x256xbf16>
    tpu.vector_store %arg10[%c0_14, %c0_15, %c0_16], %20 {strides = array<i32>} : memref<1x4x256xbf16, #tpu.memory_space<vmem>>, vector<1x4x256xbf16>,
    %21 = tpu.iota {dimensions = array<i32: 0>} : vector<8x256xi32>
    %c0_i32 = arith.constant 0 : i32
    %22 = vector.broadcast %c0_i32 : i32 to vector<8x256xi32>
    %23 = arith.cmpi eq, %21, %22 : vector<8x256xi32>
    %cst_17 = arith.constant 1.000000e+00 : f32
    %cst_18 = arith.constant 0.000000e+00 : f32
    %24 = vector.broadcast %cst_17 : f32 to vector<8x256xf32>
    %25 = vector.broadcast %cst_18 : f32 to vector<8x256xf32>
    %26 = arith.select %23, %24, %25 : vector<8x256xi1>, vector<8x256xf32>
    %27 = arith.truncf %26 : vector<8x256xf32> to vector<8x256xbf16>
    %c0_19 = arith.constant 0 : index
    %c0_20 = arith.constant 0 : index
    %28 = vector.load %arg7[%c0_19, %c0_20] : memref<32x32xbf16, #tpu.memory_space<vmem>>, vector<32x32xbf16>
    %cst_21 = arith.constant dense<0.000000e+00> : vector<32x256xf32>
    %29 = tpu.matmul %28, %2, %cst_21 {dimension_numbers = #tpu.dot_dimension_numbers<[1], [0], [0], [1], [0, 0, 1, 1], [], []>} : vector<32x32xbf16>, vector<32x256xbf16>, vector<32x256xf32> -> vector<32x256xf32>
    %c0_22 = arith.constant 0 : index
    %c0_23 = arith.constant 0 : index
    %30 = vector.load %arg8[%c0_22, %c0_23] : memref<32x1xf32, #tpu.memory_space<vmem>>, vector<32x1xf32>
    %31 = vector.broadcast %30 : vector<32x1xf32> to vector<32x256xf32>
    %32 = arith.addf %29, %31 : vector<32x256xf32>
    %33 = arith.truncf %32 : vector<32x256xf32> to vector<32x256xbf16>
    %34 = tpu.concatenate %33, %27 in 0 : vector<32x256xbf16>, vector<8x256xbf16> -> vector<40x256xbf16>
    %c0_24 = arith.constant 0 : index
    %c0_25 = arith.constant 0 : index
    %c0_26 = arith.constant 0 : index
    %35 = vector.load %arg11[%c0_24, %c0_25, %c0_26] : memref<1x40x256xbf16, #tpu.memory_space<vmem>>, vector<1x40x256xbf16>
    %36 = vector.shape_cast %35 : vector<1x40x256xbf16> to vector<40x256xbf16>
    %37 = vector.shape_cast %34 : vector<40x256xbf16> to vector<1x40x256xbf16>
    tpu.vector_store %arg11[%c0_24, %c0_25, %c0_26], %37 {strides = array<i32>} : memref<1x40x256xbf16, #tpu.memory_space<vmem>>, vector<1x40x256xbf16>,
    return
  }
  func.func @transform_0(%arg0: i32, %arg1: i32) -> (i32, i32, i32) {
    %c0_i32 = arith.constant 0 : i32
    %c0_i32_0 = arith.constant 0 : i32
    return %arg0, %c0_i32, %arg1 : i32, i32, i32
  }
  func.func @transform_1(%arg0: i32, %arg1: i32) -> (i32, i32) {
    %c0_i32 = arith.constant 0 : i32
    %c0_i32_0 = arith.constant 0 : i32
    %c0_i32_1 = arith.constant 0 : i32
    return %c0_i32, %c0_i32_0 : i32, i32
  }
  func.func @transform_2(%arg0: i32, %arg1: i32) -> (i32, i32) {
    %c0_i32 = arith.constant 0 : i32
    %c0_i32_0 = arith.constant 0 : i32
    %c0_i32_1 = arith.constant 0 : i32
    return %c0_i32, %c0_i32_0 : i32, i32
  }
  func.func @transform_3(%arg0: i32, %arg1: i32) -> (i32, i32) {
    %c0_i32 = arith.constant 0 : i32
    %c0_i32_0 = arith.constant 0 : i32
    %c0_i32_1 = arith.constant 0 : i32
    return %c0_i32, %c0_i32_0 : i32, i32
  }
  func.func @transform_4(%arg0: i32, %arg1: i32) -> (i32, i32) {
    %c0_i32 = arith.constant 0 : i32
    %c0_i32_0 = arith.constant 0 : i32
    %c0_i32_1 = arith.constant 0 : i32
    return %c0_i32, %c0_i32_0 : i32, i32
  }
  func.func @transform_5(%arg0: i32, %arg1: i32) -> (i32, i32) {
    %c0_i32 = arith.constant 0 : i32
    %c0_i32_0 = arith.constant 0 : i32
    %c0_i32_1 = arith.constant 0 : i32
    return %c0_i32, %c0_i32_0 : i32, i32
  }
  func.func @transform_6(%arg0: i32, %arg1: i32) -> (i32, i32) {
    %c0_i32 = arith.constant 0 : i32
    %c0_i32_0 = arith.constant 0 : i32
    %c0_i32_1 = arith.constant 0 : i32
    return %c0_i32, %c0_i32_0 : i32, i32
  }
  func.func @transform_7(%arg0: i32, %arg1: i32) -> (i32, i32, i32) {
    %c0_i32 = arith.constant 0 : i32
    %c0_i32_0 = arith.constant 0 : i32
    return %arg0, %c0_i32, %arg1 : i32, i32, i32
  }
  func.func @transform_8(%arg0: i32, %arg1: i32) -> (i32, i32, i32) {
    %c0_i32 = arith.constant 0 : i32
    %c0_i32_0 = arith.constant 0 : i32
    return %arg0, %c0_i32, %arg1 : i32, i32, i32
  }
  func.func @transform_9(%arg0: i32, %arg1: i32) -> (i32, i32, i32) {
    %c0_i32 = arith.constant 0 : i32
    %c0_i32_0 = arith.constant 0 : i32
    return %arg0, %c0_i32, %arg1 : i32, i32, i32
  }
}

</mosaic_0001>

<bundles_post_ra>
// kernel: bidirectional_attention.2
= control target key start
LH: loop header
LB: loop body
LE: loop exit
PB: predicated region body
PF: predicated region fallthrough
CT: control target
= control target key end

     0   :  { %s1029_s30 = smov 0   ;;  %s1031_s10 = smov 0   ;;  %s1114_s0 = inlined_call_operand.vmem [shape: f32[2,32,256], index: 0, kind: input, shape index: {}]   ;;  %s1115_s1 = inlined_call_operand.vmem [shape: bf16[4,32], index: 1, kind: input, shape index: {}]   ;;  %s1116_s2 = inlined_call_operand.vmem [shape: f32[4,1], index: 2, kind: input, shape index: {}]   ;;  %s1117_s3 = inlined_call_operand.vmem [shape: bf16[4,32], index: 3, kind: input, shape index: {}]   ;;  %s1118_s4 = inlined_call_operand.vmem [shape: f32[4,1], index: 4, kind: input, shape index: {}]   ;;  %s1119_s5 = inlined_call_operand.vmem [shape: bf16[32,32], index: 5, kind: input, shape index: {}]   ;;  %s1120_s6 = inlined_call_operand.vmem [shape: f32[32,1], index: 6, kind: input, shape index: {}]   ;;  %s1121_s7 = inlined_call_operand.vmem [shape: bf16[2,4,256], index: 7, kind: output, shape index: {0}]   ;;  %s1122_s8 = inlined_call_operand.vmem [shape: bf16[2,4,256], index: 8, kind: output, shape index: {1}]   ;;  %s1123_s9 = inlined_call_operand.vmem [shape: bf16[2,40,256], index: 9, kind: output, shape index: {2}]  }
   0x1   :  { %s1033_s11 = smov 0  }
   0x2 LB: > { %s32_s12 = sadd.s32 1, %s971_s10  ;;  %p889_p0 = scmp.ge.s32.totalorder %s975_s11, 1  ;;  %s975_s11 = sphi %s1033_s11, %s20_s11   ;;  %s971_s10 = sphi %s1031_s10, %s1125_s10   ;;  %s967_s30 = sphi %s1029_s30, %s1124_s30  }
   0x3   : > { %p34_p1 = scmp.ge.s32.totalorder %s32_s12, 2  ;;  %p317_p2 = scmp.lt.s32.totalorder %s975_s11, 3 }
   0x5   : > { %s1127_s12 = smov (%p34_p1, %s32_s12), 0  ;;  %p318_p3 = pnand %p889_p0, %p317_p2 }
   0x6   : > { %p380_p4 = scmp.lt.s32.totalorder (!%p318_p3), %s967_s30, 1  ;;  %v977_v0 = vmov (!%p318_p3), 0   ;;  %v572_v1 = vld [vmem:[%s1120_s6] sm:$0xff] (!%p318_p3)  ;;  %v573_v3 = vld [vmem:[%s1120_s6 + $0x8] sm:$0xff] (!%p318_p3)  ;;  %v575_v16 = vld [vmem:[%s1120_s6 + $0x18] sm:$0xff] (!%p318_p3)  ;;  %vm439_vm0 = vcmask (!%p318_p3), 261120   ;;  %v563_v23 = vlaneseq (!%p318_p3) }
   0x7   : > { %321 = sbr.rel (%p318_p3) target bundleno = 256 (0x100), region = 48  ;;  %475 = vmatprep.mubr.bf16.mxu1 (!%p318_p3), %v977_v0  ;;  %644 = vmatprep.mubr.bf16.mxu0 (!%p318_p3), %v977_v0  ;;  %v433_v2 = vld [vmem:[%s1116_s2] sm:$0xf] (!%p318_p3)  ;;  %v574_v17 = vld [vmem:[%s1120_s6 + $0x10] sm:$0xff] (!%p318_p3)  ;;  %v952_v21 = vld [vmem:[%s1119_s5 + $0x8] sm:$0xff] (!%p318_p3)   ;;  %v978_v25 = vmov (!%p318_p3), 0.0  }
   0x8   : > { %950 = vset.pattern.permute.xlu1 (!%p318_p3), %v977_v0  ;;  %949 = vset.pattern.permute.xlu0 (!%p318_p3), %v977_v0  ;;  %v499_v4 = vld [vmem:[%s1118_s4] sm:$0xf] (!%p318_p3)  ;;  %v564_v24 = vshrl.u32 (!%p318_p3), %v563_v23, 7 }
   0x9   : > { %578 = vperm.xlu1 (!%p318_p3), %950, %v572_v1   ;;  %436 = vperm.xlu0 (!%p318_p3), %949, %v433_v2   ;;  %v951_v19 = vld [vmem:[%s1119_s5] sm:$0xff] (!%p318_p3)  }
   0xa   : > { %v432_v20 = vld [vmem:[%s1115_s1] sm:$0x3] (!%p318_p3)  ;;  %vm565_vm1 = vcmp.eq.s32.totalorder (!%p318_p3), %v564_v24, 0 }
   0xb   : > { %v498_v22 = vld [vmem:[%s1117_s3] sm:$0x3] (!%p318_p3)  ;;  %v566_v26 = vsel (!%p318_p3), %vm565_vm1, 1.0, %v978_v25 }
   0xc   : > { %v921_v27 = vpack.c.bf16 (!%p318_p3), %v566_v26, %v566_v26 }
   0xd   : > { %583 = vperm.xlu1 (!%p318_p3), %950, %v573_v3   ;;  %502 = vperm.xlu0 (!%p318_p3), %949, %v499_v4  }
   0xe   : > { %s1129_s30 = smov (!%p380_p4, %s967_s30), 1 }
   0xf   : > { %s914_s17 = sshll.u32 %s1129_s30, 6  ;;  %s915_s24 = sshll.u32 %s1129_s30, 2 }
  0x10   : > { %s387_s20 = scalar_lea.vmem %s1114_s0, %s914_s17  ;;  %s397_s27 = scalar_lea.vmem %s1121_s7, %s915_s24 }
  0x11   : > { %v421_v5 = vld [vmem:[%s387_s20 + $0x8] sm:$0xff]  ;;  %v423_v6 = vld [vmem:[%s387_s20 + $0x18] sm:$0xff]  ;;  %v420_v7 = vld [vmem:[%s387_s20] sm:$0xff]  ;;  %593 = vperm.xlu1 %950, %v575_v16   ;;  %588 = vperm.xlu0 %949, %v574_v17   ;;  %s407_s13 = scalar_lea.vmem %s1122_s8, %s915_s24 }
  0x12   : > { %v429_v8 = vpack.c.bf16 %v423_v6, %v421_v5  ;;  %v422_v9 = vld [vmem:[%s387_s20 + $0x10] sm:$0xff]  ;;  %v425_v10 = vld [vmem:[%s387_s20 + $0x28] sm:$0xff]  ;;  %v427_v11 = vld [vmem:[%s387_s20 + $0x38] sm:$0xff] }
  0x13   : > { %v428_v12 = vpack.c.bf16 %v422_v9, %v420_v7  ;;  %v431_v13 = vpack.c.bf16 %v427_v11, %v425_v10  ;;  %v424_v14 = vld [vmem:[%s387_s20 + $0x20] sm:$0xff]  ;;  %v426_v15 = vld [vmem:[%s387_s20 + $0x30] sm:$0xff]  ;;  %s922_s20 = smul.u32 40, %s1129_s30 }
  0x14   : > { %443 = vmatprep.subr.bf16.mxu1 %v429_v8  ;;  %612 = vmatprep.subr.bf16.mxu0 %v429_v8  ;;  %v430_v18 = vpack.c.bf16 %v426_v15, %v424_v14 }
  0x15   : > { %444 = vmatpush1.bf16.msra.mxu1 %v428_v12  ;;  %613 = vmatpush1.bf16.msra.mxu0 %v428_v12  ;;  %s1087_s23 = scalar_lea.vmem %s1123_s9, %s922_s20 }
  0x16   : > { %445 = vmatprep.subr.bf16.mxu1 %v431_v13  ;;  %614 = vmatprep.subr.bf16.mxu0 %v431_v13  ;;  %697 = vst [vmem:[%s1087_s23 + $0x20] sm:$0xff] %v921_v27 }
  0x19   : > { %446 = vmatpush1.bf16.msra.mxu1 %v430_v18  ;;  %615 = vmatpush1.bf16.msra.mxu0 %v430_v18 }
  0x1a   : > { %508 = vmatprep.subr.bf16.mxu1 %v429_v8 }
  0x1c   : > { %897 = vmatmul.mubr.msk.bf16.vlgmr.msra.gmra.mrb[0].mxu1 %vm439_vm0, %v432_v20  ;;  %905 = vmatmul.mubr.msk.bf16.vlgmr.msra.gmra.mrb[0].mxu0 %vm439_vm0, %v951_v19 }
  0x1d   : > { %509 = vmatpush1.bf16.msra.mxu1 %v428_v12  ;;  %540 = vmatprep.mubr.bf16.mxu1 %v977_v0 }
  0x1e   : > { %510 = vmatprep.subr.bf16.mxu1 %v431_v13  ;;  %654 = vmatprep.mubr.bf16.mxu0 %v977_v0 }
  0x21   : > { %511 = vmatpush1.bf16.msra.mxu1 %v430_v18 }
  0x24   : > { %900 = vmatmul.mubr.msk.bf16.vlgmr.msra.gmra.mrb[4].mxu1 %vm439_vm0, %v498_v22  ;;  %906 = vmatmul.mubr.msk.bf16.gmra.mrb[4].mxu0 %vm439_vm0, %v952_v21 }
  0x88   : > { %v579_v28 = vpop.permute.xlu1 %578  ;;  %v437_v29 = vpop.permute.xlu0 %436 }
  0x8c   : > { %v584_v30 = vpop.permute.xlu1 %583  ;;  %v503_v31 = vpop.permute.xlu0 %502 }
  0x90   : > { %v594_v49 = vpop.permute.xlu1 %593  ;;  %v589_v50 = vpop.permute.xlu0 %588 }
  0xef   : > { %v477_v32 = vpop.f32.mrb[0].mxu1  ;;  %v646_v33 = vpop.f32.mrb[0].mxu0 }
  0xf0   : > { %v478_v34 = vadd.f32 %v477_v32, %v437_v29  ;;  %v647_v35 = vadd.f32 %v646_v33, %v579_v28  ;;  %v479_v36 = vpop.f32.mrb[1].mxu1  ;;  %v648_v37 = vpop.f32.mrb[1].mxu0 }
  0xf1   : > { %v480_v38 = vadd.f32 %v479_v36, %v437_v29  ;;  %v649_v39 = vadd.f32 %v648_v37, %v579_v28  ;;  %v481_v40 = vpop.f32.mrb[2].mxu1  ;;  %v650_v41 = vpop.f32.mrb[2].mxu0 }
  0xf2   : > { %v651_v42 = vadd.f32 %v650_v41, %v584_v30  ;;  %v482_v43 = vpop.f32.mrb[3].mxu1  ;;  %v652_v44 = vpop.f32.mrb[3].mxu0 }
  0xf3   : > { %v898_v45 = vpack.c.bf16 %v480_v38, %v478_v34  ;;  %v917_v46 = vpack.c.bf16 %v649_v39, %v647_v35  ;;  %v653_v47 = vadd.f32 %v652_v44, %v584_v30 }
  0xf5   : > { %899 = vst.sshfl [vmem:[%s397_s27] sm:$0x33 pattern:$0x76325410] %v898_v45  ;;  %693 = vst [vmem:[%s1087_s23] sm:$0xff] %v917_v46  ;;  %v918_v48 = vpack.c.bf16 %v653_v47, %v651_v42 }
  0xf7   : > { %694 = vst [vmem:[%s1087_s23 + $0x8] sm:$0xff] %v918_v48  ;;  %v542_v51 = vpop.f32.mrb[4].mxu1  ;;  %v656_v52 = vpop.f32.mrb[4].mxu0 }
  0xf8   : > { %v543_v53 = vadd.f32 %v542_v51, %v503_v31  ;;  %v657_v54 = vadd.f32 %v656_v52, %v589_v50  ;;  %v544_v55 = vpop.f32.mrb[5].mxu1  ;;  %v658_v56 = vpop.f32.mrb[5].mxu0 }
  0xf9   : > { %v545_v57 = vadd.f32 %v544_v55, %v503_v31  ;;  %v659_v58 = vadd.f32 %v658_v56, %v589_v50  ;;  %v546_v59 = vpop.f32.mrb[6].mxu1  ;;  %v660_v60 = vpop.f32.mrb[6].mxu0 }
  0xfa   : > { %v661_v61 = vadd.f32 %v660_v60, %v594_v49  ;;  %v547_v62 = vpop.f32.mrb[7].mxu1  ;;  %v662_v63 = vpop.f32.mrb[7].mxu0 }
  0xfb   : > { %v901_v0 = vpack.c.bf16 %v545_v57, %v543_v53  ;;  %v919_v1 = vpack.c.bf16 %v659_v58, %v657_v54  ;;  %v663_v2 = vadd.f32 %v662_v63, %v594_v49 }
  0xfd   : > { %902 = vst.sshfl [vmem:[%s407_s13] sm:$0x33 pattern:$0x76325410] %v901_v0  ;;  %695 = vst [vmem:[%s1087_s23 + $0x10] sm:$0xff] %v919_v1  ;;  %v920_v3 = vpack.c.bf16 %v663_v2, %v661_v61 }
  0xff   : > { %696 = vst [vmem:[%s1087_s23 + $0x18] sm:$0xff] %v920_v3 }
 0x100 PF: > { %s20_s11 = sadd.s32 1, %s975_s11   ;;  %s1124_s30 = smov %s971_s10 }
 0x101   : > { %p17_p5 = scmp.ge.s32.totalorder %s20_s11, 4   ;;  %s1125_s10 = smov %s1127_s12 }
 0x103   :  { %19 = sbr.rel (!%p17_p5) target bundleno = 2 (0x2), region = 102 }

// kernel: bidirectional_attention.3
= control target key start
LH: loop header
LB: loop body
LE: loop exit
PB: predicated region body
PF: predicated region fallthrough
CT: control target
= control target key end

     0   :  { %s1669_s20 = smov 0   ;;  %s1671_s21 = smov 0   ;;  %s2284_s0 = inlined_call_operand.vmem [shape: f32[2,32,256], index: 0, kind: input, shape index: {}]   ;;  %s2285_s1 = inlined_call_operand.vmem [shape: bf16[2,4,256], index: 1, kind: input, shape index: {}]   ;;  %s2286_s2 = inlined_call_operand.vmem [shape: bf16[2,4,256], index: 2, kind: input, shape index: {}]   ;;  %s2287_s3 = inlined_call_operand.vmem [shape: bf16[2,40,256], index: 3, kind: input, shape index: {}]   ;;  %s2288_s4 = inlined_call_operand.<no memory space> [shape: f32[1], index: 4, kind: input, shape index: {}]   ;;  %s2289_s5 = inlined_call_operand.vmem [shape: f32[2,32,256], index: 5, kind: output, shape index: {}]  }
   0x1   :  { %10 = sst [smem:[#allocation4]] %s2288_s4  ;;  %s1673_s22 = smov 0  }
   0x2 LB: > { %s35_s4 = sadd.s32 1, %s1627_s21  ;;  %p1399_p0 = scmp.ge.s32.totalorder %s1631_s22, 1  ;;  %s1631_s22 = sphi %s1673_s22, %s16_s22   ;;  %s1627_s21 = sphi %s1671_s21, %s2485_s21   ;;  %s1623_s20 = sphi %s1669_s20, %s2484_s20  }
   0x3   : > { %p37_p1 = scmp.ge.s32.totalorder %s35_s4, 2  ;;  %p267_p2 = scmp.lt.s32.totalorder %s1631_s22, 3 }
   0x5   : > { %s2487_s4 = smov (%p37_p1, %s35_s4), 0  ;;  %p268_p3 = pnand %p1399_p0, %p267_p2 }
   0x7   : > { %271 = sbr.rel (%p268_p3) target bundleno = 831 (0x33f), region = 40 }
   0xe   : > { %p331_p4 = scmp.lt.s32.totalorder %s1623_s20, 1  ;;  %v1633_v0 = vmov 0   ;;  %vm508_vm0 = vcmask 1041408   ;;  %vm459_vm1 = vcmask 31744   ;;  %v2290_v26 = vlaneseq  ;;  %s1217_s9 = sld [smem:[#allocation4]] }
   0xf   : > { %547 = vmatprep.mubr.bf16.mxu0 %v1633_v0  ;;  %v1634_v33 = vmov -inf  }
  0x10   : > { %s2489_s20 = smov (!%p331_p4, %s1623_s20), 1  ;;  %vm1727_vm2 = vcmp.lt.s32.totalorder %v2290_v26, 256 }
  0x11   : > { %s1437_s23 = sshll.u32 %s2489_s20, 2  ;;  %389 = vst.msk [vmem:[#allocation2] sm:$0x3] %vm1727_vm2, %v1634_v33  ;;  %s1440_s30 = smul.u32 40, %s2489_s20 }
  0x12   : > { %s358_s26 = scalar_lea.vmem %s2286_s2, %s1437_s23  ;;  %s348_s29 = scalar_lea.vmem %s2285_s1, %s1437_s23 }
  0x13   : > { %v1409_v1 = vld.sshfl [vmem:[%s358_s26] sm:$0x33 pattern:$0x76325410]  ;;  %s1912_s8 = scalar_lea.vmem %s2287_s3, %s1440_s30  ;;  %s1436_s10 = sshll.u32 %s2489_s20, 6 }
  0x14   : > { %418 = vxpose.xlu0.c.b16.start.end [1/1] (short) %v1409_v1, 128  ;;  %v1410_v2 = vld.sshfl [vmem:[%s348_s29] sm:$0x33 pattern:$0x76325410]  ;;  %v415_v5 = vcombine.high %v1409_v1, %v1409_v1  ;;  %s338_s13 = scalar_lea.vmem %s2284_s0, %s1436_s10  ;;  %s378_s16 = scalar_lea.vmem %s2289_s5, %s1436_s10 }
  0x15   : > { %v458_v3 = vcombine.high %v1410_v2, %v1410_v2  ;;  %v510_v4 = vsel %vm508_vm0, %v1410_v2, 0 }
  0x17   : > { %1411 = vmatprep.subr.msk.bf16.mxu0 %vm508_vm0, %v458_v3 }
  0x18   : > { %516 = vmatpush1.bf16.msra.mxu0 %v510_v4 }
  0x31   : > { %434 = vxpose.xlu0.c.b16.start.end [1/1] (short) %v415_v5, 128 }
  0x7a   : > { %v426_v6 = vpop.trf.xlu0 }
  0x7b   : > { %1412 = vmatmul.mubr.msk.bf16.vlgmr.msra.gmra.mrb[0].mxu0 %vm459_vm1, %v426_v6 }
  0x7c   : > { %557 = vmatprep.mubr.bf16.mxu0 %v1633_v0 }
  0x7e   : > { %v427_v7 = vpop.trf.xlu0 }
  0x82   : > { %v428_v8 = vpop.trf.xlu0 }
  0x83   : > { %1413 = vmatmul.mubr.msk.bf16.gmra.mrb[4].mxu0 %vm459_vm1, %v427_v7 }
  0x84   : > { %567 = vmatprep.mubr.bf16.mxu0 %v1633_v0 }
  0x86   : > { %v429_v9 = vpop.trf.xlu0 }
  0x8a   : > { %v430_v10 = vpop.trf.xlu0 }
  0x8b   : > { %1414 = vmatmul.mubr.msk.bf16.gmra.mrb[8].mxu0 %vm459_vm1, %v428_v8 }
  0x8c   : > { %577 = vmatprep.mubr.bf16.mxu0 %v1633_v0 }
  0x8e   : > { %v431_v11 = vpop.trf.xlu0 }
  0x92   : > { %v432_v12 = vpop.trf.xlu0 }
  0x93   : > { %1415 = vmatmul.mubr.msk.bf16.gmra.mrb[12].mxu0 %vm459_vm1, %v429_v9 }
  0x94   : > { %587 = vmatprep.mubr.bf16.mxu0 %v1633_v0 }
  0x96   : > { %v433_v13 = vpop.trf.xlu0 }
  0x9a   : > { %v442_v14 = vpop.trf.xlu0 }
  0x9b   : > { %1416 = vmatmul.mubr.msk.bf16.gmra.mrb[16].mxu0 %vm459_vm1, %v430_v10 }
  0x9c   : > { %597 = vmatprep.mubr.bf16.mxu0 %v1633_v0 }
  0x9e   : > { %v443_v15 = vpop.trf.xlu0 }
  0xa2   : > { %v444_v16 = vpop.trf.xlu0 }
  0xa3   : > { %1417 = vmatmul.mubr.msk.bf16.gmra.mrb[20].mxu0 %vm459_vm1, %v431_v11 }
  0xa4   : > { %607 = vmatprep.mubr.bf16.mxu0 %v1633_v0 }
  0xa6   : > { %v445_v17 = vpop.trf.xlu0 }
  0xaa   : > { %v446_v18 = vpop.trf.xlu0 }
  0xab   : > { %1418 = vmatmul.mubr.msk.bf16.gmra.mrb[24].mxu0 %vm459_vm1, %v432_v12 }
  0xac   : > { %617 = vmatprep.mubr.bf16.mxu0 %v1633_v0 }
  0xae   : > { %v447_v19 = vpop.trf.xlu0 }
  0xb2   : > { %v448_v20 = vpop.trf.xlu0 }
  0xb3   : > { %1419 = vmatmul.mubr.msk.bf16.gmra.mrb[28].mxu0 %vm459_vm1, %v433_v13 }
  0xb4   : > { %627 = vmatprep.mubr.bf16.mxu0 %v1633_v0 }
  0xb6   : > { %v449_v21 = vpop.trf.xlu0 }
  0xbb   : > { %1420 = vmatmul.mubr.msk.bf16.gmra.mrb[32].mxu0 %vm459_vm1, %v442_v14 }
  0xbc   : > { %637 = vmatprep.mubr.bf16.mxu0 %v1633_v0 }
  0xc3   : > { %1421 = vmatmul.mubr.msk.bf16.gmra.mrb[36].mxu0 %vm459_vm1, %v443_v15 }
  0xc4   : > { %647 = vmatprep.mubr.bf16.mxu0 %v1633_v0 }
  0xcb   : > { %1422 = vmatmul.mubr.msk.bf16.gmra.mrb[40].mxu0 %vm459_vm1, %v444_v16 }
  0xcc   : > { %657 = vmatprep.mubr.bf16.mxu0 %v1633_v0 }
  0xd3   : > { %1423 = vmatmul.mubr.msk.bf16.gmra.mrb[44].mxu0 %vm459_vm1, %v445_v17 }
  0xd4   : > { %667 = vmatprep.mubr.bf16.mxu0 %v1633_v0 }
  0xdb   : > { %1424 = vmatmul.mubr.msk.bf16.gmra.mrb[48].mxu0 %vm459_vm1, %v446_v18 }
  0xdc   : > { %677 = vmatprep.mubr.bf16.mxu0 %v1633_v0 }
  0xe3   : > { %1425 = vmatmul.mubr.msk.bf16.gmra.mrb[52].mxu0 %vm459_vm1, %v447_v19 }
  0xe4   : > { %687 = vmatprep.mubr.bf16.mxu0 %v1633_v0 }
  0xeb   : > { %1426 = vmatmul.mubr.msk.bf16.gmra.mrb[56].mxu0 %vm459_vm1, %v448_v20 }
  0xec   : > { %697 = vmatprep.mubr.bf16.mxu0 %v1633_v0 }
  0xf3   : > { %1427 = vmatmul.mubr.msk.bf16.gmra.mrb[60].mxu0 %vm459_vm1, %v449_v21 }
 0x14e   : > { %v1712_v22 = vpop.f32.mrb[0].mxu0 }
 0x14f   : > { %v1714_v23 = vpop.f32.mrb[1].mxu0 }
 0x150   : > { %v1716_v24 = vpop.f32.mrb[2].mxu0 }
 0x151   : > { %v1718_v25 = vpop.f32.mrb[3].mxu0 }
 0x156   : > { %v1720_v27 = vpop.f32.mrb[4].mxu0 }
 0x157   : > { %v709_v28 = vmax.f32 %v1712_v22, %v1720_v27  ;;  %v1724_v29 = vpop.f32.mrb[5].mxu0 }
 0x158   : > { %v746_v31 = vmax.f32 %v1714_v23, %v1724_v29  ;;  %v1733_v32 = vpop.f32.mrb[6].mxu0 }
 0x159   : > { %v710_v34 = vmax.f32 %v1716_v24, %v1733_v32  ;;  %v1739_v35 = vpop.f32.mrb[7].mxu0 }
 0x15a   : > { %v747_v36 = vmax.f32 %v1718_v25, %v1739_v35 }
 0x15e   : > { %v1743_v37 = vpop.f32.mrb[8].mxu0 }
 0x15f   : > { %v711_v38 = vmax.f32 %v709_v28, %v1743_v37  ;;  %v1746_v39 = vpop.f32.mrb[9].mxu0 }
 0x160   : > { %v748_v40 = vmax.f32 %v746_v31, %v1746_v39  ;;  %v1749_v41 = vpop.f32.mrb[10].mxu0 }
 0x161   : > { %v712_v42 = vmax.f32 %v710_v34, %v1749_v41  ;;  %v1752_v43 = vpop.f32.mrb[11].mxu0 }
 0x162   : > { %v749_v44 = vmax.f32 %v747_v36, %v1752_v43 }
 0x166   : > { %v1755_v45 = vpop.f32.mrb[12].mxu0 }
 0x167   : > { %v713_v46 = vmax.f32 %v711_v38, %v1755_v45  ;;  %v1758_v47 = vpop.f32.mrb[13].mxu0 }
 0x168   : > { %v750_v48 = vmax.f32 %v748_v40, %v1758_v47  ;;  %v1761_v49 = vpop.f32.mrb[14].mxu0 }
 0x169   : > { %v714_v50 = vmax.f32 %v712_v42, %v1761_v49  ;;  %v1764_v51 = vpop.f32.mrb[15].mxu0 }
 0x16a   : > { %v751_v52 = vmax.f32 %v749_v44, %v1764_v51 }
 0x16e   : > { %v1767_v53 = vpop.f32.mrb[16].mxu0 }
 0x16f   : > { %v715_v54 = vmax.f32 %v713_v46, %v1767_v53  ;;  %v1770_v55 = vpop.f32.mrb[17].mxu0 }
 0x170   : > { %v752_v56 = vmax.f32 %v750_v48, %v1770_v55  ;;  %v1773_v57 = vpop.f32.mrb[18].mxu0 }
 0x171   : > { %v716_v58 = vmax.f32 %v714_v50, %v1773_v57  ;;  %v1776_v59 = vpop.f32.mrb[19].mxu0 }
 0x172   : > { %v753_v60 = vmax.f32 %v751_v52, %v1776_v59 }
 0x176   : > { %v1779_v61 = vpop.f32.mrb[20].mxu0 }
 0x177   : > { %v717_v62 = vmax.f32 %v715_v54, %v1779_v61  ;;  %v1782_v63 = vpop.f32.mrb[21].mxu0 }
 0x178   : > { %v754_v0 = vmax.f32 %v752_v56, %v1782_v63  ;;  %v1785_v1 = vpop.f32.mrb[22].mxu0 }
 0x179   : > { %v718_v2 = vmax.f32 %v716_v58, %v1785_v1  ;;  %v1788_v3 = vpop.f32.mrb[23].mxu0 }
 0x17a   : > { %v755_v4 = vmax.f32 %v753_v60, %v1788_v3 }
 0x17e   : > { %v1791_v5 = vpop.f32.mrb[24].mxu0 }
 0x17f   : > { %v719_v6 = vmax.f32 %v717_v62, %v1791_v5  ;;  %v1794_v7 = vpop.f32.mrb[25].mxu0 }
 0x180   : > { %v756_v8 = vmax.f32 %v754_v0, %v1794_v7  ;;  %v1797_v9 = vpop.f32.mrb[26].mxu0 }
 0x181   : > { %v720_v10 = vmax.f32 %v718_v2, %v1797_v9  ;;  %v1800_v11 = vpop.f32.mrb[27].mxu0 }
 0x182   : > { %v757_v12 = vmax.f32 %v755_v4, %v1800_v11 }
 0x186   : > { %v1803_v13 = vpop.f32.mrb[28].mxu0 }
 0x187   : > { %v721_v14 = vmax.f32 %v719_v6, %v1803_v13  ;;  %v1806_v15 = vpop.f32.mrb[29].mxu0 }
 0x188   : > { %v758_v16 = vmax.f32 %v756_v8, %v1806_v15  ;;  %v1809_v17 = vpop.f32.mrb[30].mxu0 }
 0x189   : > { %v722_v18 = vmax.f32 %v720_v10, %v1809_v17  ;;  %v1812_v19 = vpop.f32.mrb[31].mxu0 }
 0x18a   : > { %v759_v20 = vmax.f32 %v757_v12, %v1812_v19 }
 0x18e   : > { %v1815_v21 = vpop.f32.mrb[32].mxu0 }
 0x18f   : > { %v723_v28 = vmax.f32 %v721_v14, %v1815_v21  ;;  %v1818_v31 = vpop.f32.mrb[33].mxu0 }
 0x190   : > { %v760_v33 = vmax.f32 %v758_v16, %v1818_v31  ;;  %v1821_v34 = vpop.f32.mrb[34].mxu0 }
 0x191   : > { %v724_v36 = vmax.f32 %v722_v18, %v1821_v34  ;;  %v1824_v38 = vpop.f32.mrb[35].mxu0 }
 0x192   : > { %v761_v40 = vmax.f32 %v759_v20, %v1824_v38 }
 0x196   : > { %v1827_v42 = vpop.f32.mrb[36].mxu0 }
 0x197   : > { %v725_v44 = vmax.f32 %v723_v28, %v1827_v42  ;;  %v1830_v46 = vpop.f32.mrb[37].mxu0 }
 0x198   : > { %v762_v48 = vmax.f32 %v760_v33, %v1830_v46  ;;  %v1833_v50 = vpop.f32.mrb[38].mxu0 }
 0x199   : > { %2349 = vst [vmem:[#allocation5_spill] sm:$0xff] %v1833_v50  ;;  %v726_v52 = vmax.f32 %v724_v36, %v1833_v50  ;;  %v1836_v54 = vpop.f32.mrb[39].mxu0  ;;  %v1916_v50 = vld [vmem:[#allocation2] sm:$0x3] }
 0x19a   : > { %2350 = vst [vmem:[#allocation6_spill] sm:$0xff] %v1836_v54  ;;  %v763_v56 = vmax.f32 %v761_v40, %v1836_v54  ;;  %2375 = vst [vmem:[#allocation30_spill] sm:$0xff] %v1916_v50 }
 0x19e   : > { %v1839_v58 = vpop.f32.mrb[40].mxu0 }
 0x19f   : > { %2351 = vst [vmem:[#allocation7_spill] sm:$0xff] %v1839_v58  ;;  %v727_v60 = vmax.f32 %v725_v44, %v1839_v58  ;;  %v1842_v62 = vpop.f32.mrb[41].mxu0 }
 0x1a0   : > { %2352 = vst [vmem:[#allocation8_spill] sm:$0xff] %v1842_v62  ;;  %v764_v0 = vmax.f32 %v762_v48, %v1842_v62  ;;  %v1845_v2 = vpop.f32.mrb[42].mxu0 }
 0x1a1   : > { %2353 = vst [vmem:[#allocation9_spill] sm:$0xff] %v1845_v2  ;;  %v728_v4 = vmax.f32 %v726_v52, %v1845_v2  ;;  %v1848_v6 = vpop.f32.mrb[43].mxu0 }
 0x1a2   : > { %2354 = vst [vmem:[#allocation10_spill] sm:$0xff] %v1848_v6  ;;  %v765_v8 = vmax.f32 %v763_v56, %v1848_v6 }
 0x1a6   : > { %v1851_v10 = vpop.f32.mrb[44].mxu0 }
 0x1a7   : > { %2355 = vst [vmem:[#allocation11_spill] sm:$0xff] %v1851_v10  ;;  %v729_v12 = vmax.f32 %v727_v60, %v1851_v10  ;;  %v1854_v14 = vpop.f32.mrb[45].mxu0 }
 0x1a8   : > { %2356 = vst [vmem:[#allocation12_spill] sm:$0xff] %v1854_v14  ;;  %v766_v16 = vmax.f32 %v764_v0, %v1854_v14  ;;  %v1857_v18 = vpop.f32.mrb[46].mxu0 }
 0x1a9   : > { %2357 = vst [vmem:[#allocation13_spill] sm:$0xff] %v1857_v18  ;;  %v730_v20 = vmax.f32 %v728_v4, %v1857_v18  ;;  %v1860_v28 = vpop.f32.mrb[47].mxu0 }
 0x1aa   : > { %2358 = vst [vmem:[#allocation14_spill] sm:$0xff] %v1860_v28  ;;  %v767_v33 = vmax.f32 %v765_v8, %v1860_v28 }
 0x1ae   : > { %v1863_v36 = vpop.f32.mrb[48].mxu0 }
 0x1af   : > { %2359 = vst [vmem:[#allocation15_spill] sm:$0xff] %v1863_v36  ;;  %v731_v40 = vmax.f32 %v729_v12, %v1863_v36  ;;  %v1866_v44 = vpop.f32.mrb[49].mxu0 }
 0x1b0   : > { %2360 = vst [vmem:[#allocation16_spill] sm:$0xff] %v1866_v44  ;;  %v768_v48 = vmax.f32 %v766_v16, %v1866_v44  ;;  %v1869_v52 = vpop.f32.mrb[50].mxu0 }
 0x1b1   : > { %2361 = vst [vmem:[#allocation17_spill] sm:$0xff] %v1869_v52  ;;  %v732_v56 = vmax.f32 %v730_v20, %v1869_v52  ;;  %v1872_v60 = vpop.f32.mrb[51].mxu0 }
 0x1b2   : > { %2362 = vst [vmem:[#allocation18_spill] sm:$0xff] %v1872_v60  ;;  %v769_v0 = vmax.f32 %v767_v33, %v1872_v60 }
 0x1b6   : > { %v1875_v4 = vpop.f32.mrb[52].mxu0 }
 0x1b7   : > { %2363 = vst [vmem:[#allocation19_spill] sm:$0xff] %v1875_v4  ;;  %v733_v8 = vmax.f32 %v731_v40, %v1875_v4  ;;  %v1878_v26 = vpop.f32.mrb[53].mxu0 }
 0x1b8   : > { %2364 = vst [vmem:[#allocation20_spill] sm:$0xff] %v1878_v26  ;;  %v770_v12 = vmax.f32 %v768_v48, %v1878_v26  ;;  %v1881_v36 = vpop.f32.mrb[54].mxu0 }
 0x1b9   : > { %2365 = vst [vmem:[#allocation21_spill] sm:$0xff] %v1881_v36  ;;  %v734_v16 = vmax.f32 %v732_v56, %v1881_v36  ;;  %v1884_v44 = vpop.f32.mrb[55].mxu0 }
 0x1ba   : > { %2366 = vst [vmem:[#allocation22_spill] sm:$0xff] %v1884_v44  ;;  %v771_v20 = vmax.f32 %v769_v0, %v1884_v44 }
 0x1be   : > { %v1887_v52 = vpop.f32.mrb[56].mxu0 }
 0x1bf   : > { %2367 = vst [vmem:[#allocation23_spill] sm:$0xff] %v1887_v52  ;;  %v735_v33 = vmax.f32 %v733_v8, %v1887_v52  ;;  %v1890_v60 = vpop.f32.mrb[57].mxu0 }
 0x1c0   : > { %2368 = vst [vmem:[#allocation24_spill] sm:$0xff] %v1890_v60  ;;  %v772_v40 = vmax.f32 %v770_v12, %v1890_v60  ;;  %v1893_v4 = vpop.f32.mrb[58].mxu0 }
 0x1c1   : > { %2369 = vst [vmem:[#allocation25_spill] sm:$0xff] %v1893_v4  ;;  %v736_v48 = vmax.f32 %v734_v16, %v1893_v4  ;;  %v1896_v26 = vpop.f32.mrb[59].mxu0 }
 0x1c2   : > { %2370 = vst [vmem:[#allocation26_spill] sm:$0xff] %v1896_v26  ;;  %v773_v56 = vmax.f32 %v771_v20, %v1896_v26 }
 0x1c6   : > { %v1899_v36 = vpop.f32.mrb[60].mxu0 }
 0x1c7   : > { %2371 = vst [vmem:[#allocation27_spill] sm:$0xff] %v1899_v36  ;;  %v737_v0 = vmax.f32 %v735_v33, %v1899_v36  ;;  %v1902_v44 = vpop.f32.mrb[61].mxu0  ;;  %v1471_v36 = vld [vmem:[%s1912_s8 + $0x4] ss:$8 sps:$4 sm:$0xff]  }
 0x1c8   : > { %2372 = vst [vmem:[#allocation28_spill] sm:$0xff] %v1902_v44  ;;  %v774_v8 = vmax.f32 %v772_v40, %v1902_v44  ;;  %v1905_v52 = vpop.f32.mrb[62].mxu0  ;;  %1130 = vmatprep.mubr.bf16.mxu1 %v1471_v36  ;;  %v1635_v44 = vmov 1966171168  }
 0x1c9   : > { %2373 = vst [vmem:[#allocation29_spill] sm:$0xff] %v1905_v52  ;;  %v738_v12 = vmax.f32 %v736_v48, %v1905_v52  ;;  %v705_v60 = vpop.f32.mrb[63].mxu0  ;;  %v787_v18 = vunpack.c.l.s4 %v1635_v44 }
 0x1ca   : > { %v775_v28 = vmax.f32 %v773_v56, %v705_v60 }
 0x1cb   : > { %v739_v16 = vmax.f32 %v737_v0, %v738_v12  ;;  %v788_v0 = vunpack.c.0.s8 %v787_v18  ;;  %v2374_v12 = vlaneseq  ;;  %v2379_v18 = vld [vmem:[#allocation5_spill] sm:$0xff] }
 0x1cc   : > { %v776_v20 = vmax.f32 %v774_v8, %v775_v28 }
 0x1cd   : > { %v740_v33 = vrot.slane %v739_v16, 4  ;;  %v790_v10 = vshrl.u32 %v2374_v12, 7  ;;  %v2382_v12 = vld [vmem:[#allocation8_spill] sm:$0xff] }
 0x1ce   : > { %v777_v26 = vrot.slane %v776_v20, 4 }
 0x1cf   : > { %v741_v4 = vmax.f32 %v739_v16, %v740_v33  ;;  %v791_v28 = vsub.s32 %v788_v0, %v790_v10  ;;  %v1920_v44 = vsub.s32 1, %v790_v10  ;;  %v2381_v0 = vld [vmem:[#allocation7_spill] sm:$0xff]  ;;  %v2402_v33 = vld [vmem:[#allocation28_spill] sm:$0xff] }
 0x1d0   : > { %v778_v40 = vmax.f32 %v776_v20, %v777_v26  ;;  %v1918_v26 = vsub.s32 0, %v790_v10 }
 0x1d1   : > { %v742_v48 = vrot.slane %v741_v4, 2  ;;  %2377 = vst [vmem:[#allocation32_spill] sm:$0xff] %v1920_v44 }
 0x1d2   : > { %v779_v52 = vrot.slane %v778_v40, 2  ;;  %2376 = vst [vmem:[#allocation31_spill] sm:$0xff] %v1918_v26 }
 0x1d3   : > { %v743_v14 = vmax.f32 %v741_v4, %v742_v48  ;;  %v2386_v48 = vld [vmem:[#allocation12_spill] sm:$0xff] }
 0x1d4   : > { %v780_v56 = vmax.f32 %v778_v40, %v779_v52  ;;  %v2387_v40 = vld [vmem:[#allocation13_spill] sm:$0xff] }
 0x1d5   : > { %v744_v6 = vrot.slane %v743_v14, 1 }
 0x1d6   : > { %v781_v2 = vrot.slane %v780_v56, 1 }
 0x1d7   : > { %v745_v62 = vmax.f32 %v743_v14, %v744_v6 }
 0x1d8   : > { %v782_v58 = vmax.f32 %v780_v56, %v781_v2 }
 0x1da   : > { %v785_v8 = vcombine.low %v745_v62, %v782_v58 }
 0x1dc   : > { %v792_v54 = vrot.slane %v785_v8, %v791_v28  ;;  %v2384_v8 = vld [vmem:[#allocation10_spill] sm:$0xff] }
 0x1de   : > { %v799_v36 = vrot.slane %v792_v54, %v791_v28  ;;  %v2383_v28 = vld [vmem:[#allocation9_spill] sm:$0xff] }
 0x1e0   : > { %v1923_v4 = vmax.f32 %v1916_v50, %v799_v36  ;;  %v2385_v36 = vld [vmem:[#allocation11_spill] sm:$0xff] }
 0x1e1   : > { %v2401_v50 = vld [vmem:[#allocation27_spill] sm:$0xff] }
 0x1e2   : > { %2378 = vst [vmem:[#allocation33_spill] sm:$0xff] %v1923_v4  ;;  %v1929_v6 = vrot.slane %v1923_v4, %v1918_v26  ;;  %v1933_v58 = vrot.slane %v1923_v4, %v1920_v44  ;;  %1183 = vst.msk [vmem:[#allocation2] sm:$0x3] %vm1727_vm2, %v1923_v4  ;;  %v2398_v44 = vld [vmem:[#allocation24_spill] sm:$0xff]  ;;  %v2399_v26 = vld [vmem:[#allocation25_spill] sm:$0xff] }
 0x1e4   : > { %v879_v54 = vsub.f32 %v705_v60, %v1933_v58  ;;  %v2404_v16 = vsub.f32 %v1712_v22, %v1929_v6  ;;  %v2405_v60 = vsub.f32 %v1714_v23, %v1933_v58  ;;  %v2406_v52 = vsub.f32 %v1716_v24, %v1929_v6 }
 0x1e5   : > { %v2407_v14 = vsub.f32 %v1718_v25, %v1933_v58  ;;  %v2408_v2 = vsub.f32 %v1720_v27, %v1929_v6  ;;  %v2409_v22 = vsub.f32 %v1724_v29, %v1933_v58  ;;  %v2410_v24 = vsub.f32 %v1733_v32, %v1929_v6 }
 0x1e6   : > { %v1006_v56 = vmul.f32 1.442695, %v879_v54  ;;  %v2380_v54 = vld [vmem:[#allocation6_spill] sm:$0xff]  ;;  %v880_v62 = vmul.f32 1.442695, %v2404_v16  ;;  %v2411_v25 = vsub.f32 %v1739_v35, %v1933_v58  ;;  %v2412_v27 = vsub.f32 %v1743_v37, %v1929_v6 }
 0x1e7   : > { %v882_v30 = vmul.f32 1.442695, %v2405_v60  ;;  %v884_v4 = vmul.f32 1.442695, %v2406_v52  ;;  %v886_v10 = vmul.f32 1.442695, %v2407_v14  ;;  %v2413_v29 = vsub.f32 %v1746_v39, %v1933_v58 }
 0x1e8   : > { %1477 = vpow2.f32 %v1006_v56  ;;  %v888_v20 = vmul.f32 1.442695, %v2408_v2  ;;  %v890_v23 = vmul.f32 1.442695, %v2409_v22  ;;  %v892_v52 = vmul.f32 1.442695, %v2410_v24 }
 0x1e9   : > { %1479 = vpow2.f32 %v880_v62  ;;  %v894_v14 = vmul.f32 1.442695, %v2411_v25  ;;  %v896_v62 = vmul.f32 1.442695, %v2412_v27  ;;  %v898_v2 = vmul.f32 1.442695, %v2413_v29 }
 0x1ea   : > { %1481 = vpow2.f32 %v882_v30  ;;  %v2414_v32 = vsub.f32 %v1749_v41, %v1929_v6  ;;  %v2415_v35 = vsub.f32 %v1752_v43, %v1933_v58  ;;  %v2416_v37 = vsub.f32 %v1755_v45, %v1929_v6 }
 0x1eb   : > { %1483 = vpow2.f32 %v884_v4  ;;  %v2417_v39 = vsub.f32 %v1758_v47, %v1933_v58  ;;  %v2418_v41 = vsub.f32 %v1761_v49, %v1929_v6  ;;  %v2419_v22 = vsub.f32 %v1764_v51, %v1933_v58 }
 0x1ec   : > { %1485 = vpow2.f32 %v886_v10  ;;  %v900_v4 = vmul.f32 1.442695, %v2414_v32  ;;  %v902_v10 = vmul.f32 1.442695, %v2415_v35  ;;  %v904_v30 = vmul.f32 1.442695, %v2416_v37 }
 0x1ed   : > { %1487 = vpow2.f32 %v888_v20  ;;  %v906_v16 = vmul.f32 1.442695, %v2417_v39  ;;  %v908_v56 = vmul.f32 1.442695, %v2418_v41  ;;  %v910_v45 = vmul.f32 1.442695, %v2419_v22 }
 0x1ee   : > { %1489 = vpow2.f32 %v890_v23  ;;  %v2420_v24 = vsub.f32 %v1767_v53, %v1929_v6  ;;  %v2421_v25 = vsub.f32 %v1770_v55, %v1933_v58  ;;  %v2422_v27 = vsub.f32 %v1773_v57, %v1929_v6 }
 0x1ef   : > { %1491 = vpow2.f32 %v892_v52  ;;  %v2423_v29 = vsub.f32 %v1776_v59, %v1933_v58  ;;  %v2424_v32 = vsub.f32 %v1779_v61, %v1929_v6  ;;  %v2425_v35 = vsub.f32 %v1782_v63, %v1933_v58 }
 0x1f0   : > { %1493 = vpow2.f32 %v894_v14  ;;  %v912_v52 = vmul.f32 1.442695, %v2420_v24  ;;  %v914_v14 = vmul.f32 1.442695, %v2421_v25  ;;  %v2426_v37 = vsub.f32 %v1785_v1, %v1929_v6 }
 0x1f1   : > { %1495 = vpow2.f32 %v896_v62  ;;  %v916_v62 = vmul.f32 1.442695, %v2422_v27  ;;  %v2427_v59 = vsub.f32 %v1788_v3, %v1933_v58  ;;  %v2428_v63 = vsub.f32 %v1791_v5, %v1929_v6 }
 0x1f2   : > { %v2104_v60 = vpop.eup %1477  ;;  %1497 = vpow2.f32 %v898_v2  ;;  %v918_v2 = vmul.f32 1.442695, %v2423_v29  ;;  %v2429_v1 = vsub.f32 %v1794_v7, %v1933_v58  ;;  %v2431_v5 = vsub.f32 %v1800_v11, %v1933_v58 }
 0x1f3   : > { %v1480_v20 = vpop.eup %1479  ;;  %1499 = vpow2.f32 %v900_v4  ;;  %v920_v4 = vmul.f32 1.442695, %v2424_v32  ;;  %v926_v39 = vmul.f32 1.442695, %v2427_v59  ;;  %v2432_v7 = vsub.f32 %v1803_v13, %v1929_v6 }
 0x1f4   : > { %v1482_v43 = vpop.eup %1481  ;;  %1501 = vpow2.f32 %v902_v10  ;;  %v922_v10 = vmul.f32 1.442695, %v2425_v35  ;;  %v930_v25 = vmul.f32 1.442695, %v2429_v1  ;;  %v2434_v11 = vsub.f32 %v1809_v17, %v1929_v6 }
 0x1f5   : > { %v1484_v23 = vpop.eup %1483  ;;  %1503 = vpow2.f32 %v904_v30  ;;  %v924_v30 = vmul.f32 1.442695, %v2426_v37  ;;  %v2435_v13 = vsub.f32 %v1812_v19, %v1933_v58  ;;  %v2437_v17 = vsub.f32 %v1818_v31, %v1933_v58 }
 0x1f6   : > { %v1486_v47 = vpop.eup %1485  ;;  %1505 = vpow2.f32 %v906_v16  ;;  %v1008_v41 = vpack.c.bf16 %v1484_v23, %v1480_v20  ;;  %v2430_v20 = vsub.f32 %v1797_v9, %v1929_v6  ;;  %v2433_v9 = vsub.f32 %v1806_v15, %v1933_v58 }
 0x1f7   : > { %v1488_v49 = vpop.eup %1487  ;;  %1507 = vpow2.f32 %v908_v56  ;;  %v1009_v61 = vpack.c.bf16 %v1486_v47, %v1482_v43  ;;  %v940_v32 = vmul.f32 1.442695, %v2434_v11  ;;  %v942_v35 = vmul.f32 1.442695, %v2435_v13 }
 0x1f8   : > { %v1490_v51 = vpop.eup %1489  ;;  %1509 = vpow2.f32 %v910_v45  ;;  %v928_v45 = vmul.f32 1.442695, %v2428_v63  ;;  %v932_v43 = vmul.f32 1.442695, %v2430_v20  ;;  %v938_v29 = vmul.f32 1.442695, %v2433_v9 }
 0x1f9   : > { %v1492_v53 = vpop.eup %1491  ;;  %1511 = vpow2.f32 %v912_v52  ;;  %1098 = vmatprep.subr.bf16.mxu1 %v1009_v61  ;;  %v2436_v15 = vsub.f32 %v1815_v21, %v1929_v6  ;;  %v2438_v19 = vsub.f32 %v1821_v34, %v1929_v6  ;;  %v2439_v21 = vsub.f32 %v1824_v38, %v1933_v58 }
 0x1fa   : > { %v1494_v55 = vpop.eup %1493  ;;  %1513 = vpow2.f32 %v914_v14  ;;  %v1010_v24 = vpack.c.bf16 %v1492_v53, %v1488_v49  ;;  %1099 = vmatpush1.bf16.msra.mxu1 %v1008_v41  ;;  %v934_v49 = vmul.f32 1.442695, %v2431_v5  ;;  %v2440_v31 = vsub.f32 %v1827_v42, %v1929_v6 }
 0x1fb   : > { %v1496_v57 = vpop.eup %1495  ;;  %1515 = vpow2.f32 %v916_v62  ;;  %v1011_v56 = vpack.c.bf16 %v1494_v55, %v1490_v51  ;;  %v936_v62 = vmul.f32 1.442695, %v2432_v7  ;;  %v2441_v34 = vsub.f32 %v1830_v46, %v1933_v58 }
 0x1fc   : > { %v1498_v16 = vpop.eup %1497  ;;  %1517 = vpow2.f32 %v918_v2  ;;  %v952_v63 = vmul.f32 1.442695, %v2440_v31  ;;  %v2442_v38 = vsub.f32 %v2379_v18, %v1929_v6  ;;  %v2443_v42 = vsub.f32 %v2380_v54, %v1933_v58  ;;  %v2459_v31 = vld [vmem:[#allocation18_spill] sm:$0xff] }
 0x1fd   : > { %v1500_v22 = vpop.eup %1499  ;;  %1519 = vpow2.f32 %v920_v4  ;;  %1100 = vmatprep.subr.bf16.mxu1 %v1011_v56  ;;  %v950_v56 = vmul.f32 1.442695, %v2439_v21  ;;  %v2444_v46 = vsub.f32 %v2381_v0, %v1929_v6  ;;  %v2445_v18 = vsub.f32 %v2382_v12, %v1933_v58 }
 0x1fe   : > { %v1502_v52 = vpop.eup %1501  ;;  %1521 = vpow2.f32 %v922_v10  ;;  %v1012_v3 = vpack.c.bf16 %v1500_v22, %v1496_v57  ;;  %1101 = vmatpush1.bf16.msra.mxu1 %v1010_v24  ;;  %v944_v57 = vmul.f32 1.442695, %v2436_v15  ;;  %v954_v24 = vmul.f32 1.442695, %v2441_v34 }
 0x1ff   : > { %v1504_v14 = vpop.eup %1503  ;;  %1523 = vpow2.f32 %v924_v30  ;;  %v1013_v23 = vpack.c.bf16 %v1502_v52, %v1498_v16  ;;  %v946_v30 = vmul.f32 1.442695, %v2437_v17  ;;  %v948_v16 = vmul.f32 1.442695, %v2438_v19 }
 0x200   : > { %v1506_v47 = vpop.eup %1505  ;;  %1525 = vpow2.f32 %v926_v39  ;;  %v958_v20 = vmul.f32 1.442695, %v2443_v42  ;;  %v962_v5 = vmul.f32 1.442695, %v2445_v18  ;;  %v2446_v54 = vsub.f32 %v2383_v28, %v1929_v6 }
 0x201   : > { %v1508_v27 = vpop.eup %1507  ;;  %1527 = vpow2.f32 %v928_v45  ;;  %1102 = vmatprep.subr.bf16.mxu1 %v1013_v23  ;;  %v960_v23 = vmul.f32 1.442695, %v2444_v46  ;;  %v2447_v0 = vsub.f32 %v2384_v8, %v1933_v58  ;;  %v2448_v12 = vsub.f32 %v2385_v36, %v1929_v6 }
 0x202   : > { %v1510_v51 = vpop.eup %1509  ;;  %1529 = vpow2.f32 %v930_v25  ;;  %v1014_v2 = vpack.c.bf16 %v1508_v27, %v1504_v14  ;;  %1103 = vmatpush1.bf16.msra.mxu1 %v1012_v3  ;;  %v956_v25 = vmul.f32 1.442695, %v2442_v38  ;;  %v964_v7 = vmul.f32 1.442695, %v2446_v54 }
 0x203   : > { %v1512_v53 = vpop.eup %1511  ;;  %1531 = vpow2.f32 %v932_v43  ;;  %v1015_v4 = vpack.c.bf16 %v1510_v51, %v1506_v47  ;;  %v966_v9 = vmul.f32 1.442695, %v2447_v0  ;;  %v2449_v28 = vsub.f32 %v2386_v48, %v1933_v58  ;;  %v2453_v48 = vld [vmem:[#allocation15_spill] sm:$0xff] }
 0x204   : > { %v1514_v55 = vpop.eup %1513  ;;  %1533 = vpow2.f32 %v934_v49  ;;  %v2450_v8 = vsub.f32 %v2387_v40, %v1929_v6 }
 0x205   : > { %v1516_v10 = vpop.eup %1515  ;;  %1535 = vpow2.f32 %v936_v62  ;;  %1104 = vmatprep.subr.bf16.mxu1 %v1015_v4  ;;  %v970_v11 = vmul.f32 1.442695, %v2449_v28 }
 0x206   : > { %v1518_v37 = vpop.eup %1517  ;;  %1537 = vpow2.f32 %v938_v29  ;;  %v1016_v59 = vpack.c.bf16 %v1516_v10, %v1512_v53  ;;  %1105 = vmatpush1.bf16.msra.mxu1 %v1014_v2  ;;  %v968_v2 = vmul.f32 1.442695, %v2448_v12  ;;  %v2451_v10 = vld [vmem:[#allocation14_spill] sm:$0xff] }
 0x207   : > { %v1520_v39 = vpop.eup %1519  ;;  %1539 = vpow2.f32 %v940_v32  ;;  %v1017_v61 = vpack.c.bf16 %v1518_v37, %v1514_v55  ;;  %v972_v55 = vmul.f32 1.442695, %v2450_v8  ;;  %v2452_v36 = vsub.f32 %v2451_v10, %v1933_v58 }
 0x208   : > { %v1522_v41 = vpop.eup %1521  ;;  %1541 = vpow2.f32 %v942_v35  ;;  %v2454_v37 = vsub.f32 %v2453_v48, %v1929_v6  ;;  %v2477_v48 = vld [vmem:[#allocation29_spill] sm:$0xff] }
 0x209   : > { %v1524_v22 = vpop.eup %1523  ;;  %1543 = vpow2.f32 %v944_v57  ;;  %1106 = vmatprep.subr.bf16.mxu1 %v1017_v61  ;;  %v974_v15 = vmul.f32 1.442695, %v2452_v36  ;;  %v2457_v61 = vld [vmem:[#allocation17_spill] sm:$0xff] }
 0x20a   : > { %v1526_v45 = vpop.eup %1525  ;;  %1545 = vpow2.f32 %v946_v30  ;;  %v1018_v52 = vpack.c.bf16 %v1524_v22, %v1520_v39  ;;  %1107 = vmatpush1.bf16.msra.mxu1 %v1016_v59  ;;  %v976_v17 = vmul.f32 1.442695, %v2454_v37  ;;  %v2455_v59 = vld [vmem:[#allocation16_spill] sm:$0xff]  ;;  %v2478_v37 = vsub.f32 %v2477_v48, %v1929_v6 }
 0x20b   : > { %v1528_v1 = vpop.eup %1527  ;;  %1547 = vpow2.f32 %v948_v16  ;;  %v1019_v3 = vpack.c.bf16 %v1526_v45, %v1522_v41  ;;  %v2456_v40 = vsub.f32 %v2455_v59, %v1933_v58  ;;  %v2458_v41 = vsub.f32 %v2457_v61, %v1929_v6 }
 0x20c   : > { %v1530_v14 = vpop.eup %1529  ;;  %1549 = vpow2.f32 %v950_v56 }
 0x20d   : > { %v1532_v43 = vpop.eup %1531  ;;  %1551 = vpow2.f32 %v952_v63  ;;  %1108 = vmatprep.subr.bf16.mxu1 %v1019_v3  ;;  %v978_v39 = vmul.f32 1.442695, %v2456_v40  ;;  %v980_v21 = vmul.f32 1.442695, %v2458_v41  ;;  %v2460_v63 = vsub.f32 %v2459_v31, %v1933_v58 }
 0x20e   : > { %v1534_v47 = vpop.eup %1533  ;;  %1553 = vpow2.f32 %v954_v24  ;;  %v1020_v49 = vpack.c.bf16 %v1532_v43, %v1528_v1  ;;  %1109 = vmatpush1.bf16.msra.mxu1 %v1018_v52  ;;  %v2461_v24 = vld [vmem:[#allocation19_spill] sm:$0xff]  ;;  %v2465_v43 = vld [vmem:[#allocation21_spill] sm:$0xff] }
 0x20f   : > { %v1536_v27 = vpop.eup %1535  ;;  %1555 = vpow2.f32 %v956_v25  ;;  %v1021_v62 = vpack.c.bf16 %v1534_v47, %v1530_v14  ;;  %v982_v45 = vmul.f32 1.442695, %v2460_v63  ;;  %v2462_v52 = vsub.f32 %v2461_v24, %v1929_v6  ;;  %v2463_v25 = vld [vmem:[#allocation20_spill] sm:$0xff] }
 0x210   : > { %v1538_v51 = vpop.eup %1537  ;;  %1557 = vpow2.f32 %v958_v20  ;;  %v2464_v3 = vsub.f32 %v2463_v25, %v1933_v58  ;;  %v2466_v46 = vsub.f32 %v2465_v43, %v1929_v6  ;;  %v1469_v25 = vld [vmem:[%s1912_s8] ss:$8 sps:$4 sm:$0xff]  }
 0x211   : > { %v1540_v29 = vpop.eup %1539  ;;  %1559 = vpow2.f32 %v960_v23  ;;  %1110 = vmatprep.subr.bf16.mxu1 %v1021_v62  ;;  %v984_v1 = vmul.f32 1.442695, %v2462_v52 }
 0x212   : > { %v1542_v53 = vpop.eup %1541  ;;  %1561 = vpow2.f32 %v962_v5  ;;  %v1022_v32 = vpack.c.bf16 %v1540_v29, %v1536_v27  ;;  %1111 = vmatpush1.bf16.msra.mxu1 %v1020_v49  ;;  %v986_v14 = vmul.f32 1.442695, %v2464_v3  ;;  %v988_v23 = vmul.f32 1.442695, %v2466_v46  ;;  %v2467_v5 = vld [vmem:[#allocation22_spill] sm:$0xff] }
 0x213   : > { %v1544_v4 = vpop.eup %1543  ;;  %1563 = vpow2.f32 %v964_v7  ;;  %v1023_v13 = vpack.c.bf16 %v1542_v53, %v1538_v51  ;;  %v2468_v49 = vsub.f32 %v2467_v5, %v1933_v58  ;;  %v2469_v7 = vld [vmem:[#allocation23_spill] sm:$0xff]  ;;  %v2472_v53 = vsub.f32 %v2399_v26, %v1929_v6  ;;  %v1472_v3 = vld [vmem:[%s1912_s8 + $0x14] ss:$8 sps:$4 sm:$0xff]  }
 0x214   : > { %v1546_v35 = vpop.eup %1545  ;;  %1565 = vpow2.f32 %v966_v9  ;;  %v2470_v62 = vsub.f32 %v2469_v7, %v1929_v6  ;;  %v2471_v9 = vsub.f32 %v2398_v44, %v1933_v58  ;;  %v2475_v44 = vsub.f32 %v2401_v50, %v1929_v6  ;;  %v2479_v46 = vld [vmem:[#allocation30_spill] sm:$0xff]  ;;  %v2482_v5 = vld [vmem:[#allocation31_spill] sm:$0xff] }
 0x215   : > { %v1548_v57 = vpop.eup %1547  ;;  %1567 = vpow2.f32 %v968_v2  ;;  %1112 = vmatprep.subr.bf16.mxu1 %v1023_v13  ;;  %v990_v27 = vmul.f32 1.442695, %v2468_v49  ;;  %v996_v28 = vmul.f32 1.442695, %v2472_v53  ;;  %v2476_v26 = vsub.f32 %v2402_v33, %v1933_v58 }
 0x216   : > { %v1550_v30 = vpop.eup %1549  ;;  %1569 = vpow2.f32 %v970_v11  ;;  %v1024_v19 = vpack.c.bf16 %v1548_v57, %v1544_v4  ;;  %1113 = vmatpush1.bf16.msra.mxu1 %v1022_v32  ;;  %v992_v51 = vmul.f32 1.442695, %v2470_v62  ;;  %v994_v29 = vmul.f32 1.442695, %v2471_v9  ;;  %v2473_v4 = vld [vmem:[#allocation26_spill] sm:$0xff] }
 0x217   : > { %v1552_v16 = vpop.eup %1551  ;;  %1571 = vpow2.f32 %v972_v55  ;;  %v1025_v56 = vpack.c.bf16 %v1550_v30, %v1546_v35  ;;  %v2474_v8 = vsub.f32 %v2473_v4, %v1933_v58  ;;  %v1000_v35 = vmul.f32 1.442695, %v2475_v44 }
 0x218   : > { %v1554_v22 = vpop.eup %1553  ;;  %1573 = vpow2.f32 %v974_v15  ;;  %v1002_v36 = vmul.f32 1.442695, %v2476_v26 }
 0x219   : > { %v1556_v34 = vpop.eup %1555  ;;  %1575 = vpow2.f32 %v976_v17  ;;  %1114 = vmatprep.subr.bf16.mxu1 %v1025_v56  ;;  %v998_v55 = vmul.f32 1.442695, %v2474_v8  ;;  %v1004_v17 = vmul.f32 1.442695, %v2478_v37 }
 0x21a   : > { %v1558_v38 = vpop.eup %1557  ;;  %1577 = vpow2.f32 %v978_v39  ;;  %v1026_v42 = vpack.c.bf16 %v1556_v34, %v1552_v16  ;;  %1115 = vmatpush1.bf16.msra.mxu1 %v1024_v19 }
 0x21b   : > { %v1560_v20 = vpop.eup %1559  ;;  %1579 = vpow2.f32 %v980_v21  ;;  %v1027_v47 = vpack.c.bf16 %v1558_v38, %v1554_v22 }
 0x21c   : > { %v1562_v18 = vpop.eup %1561  ;;  %1581 = vpow2.f32 %v982_v45 }
 0x21d   : > { %v1564_v54 = vpop.eup %1563  ;;  %1583 = vpow2.f32 %v984_v1  ;;  %1116 = vmatprep.subr.bf16.mxu1 %v1027_v47 }
 0x21e   : > { %v1566_v0 = vpop.eup %1565  ;;  %1585 = vpow2.f32 %v986_v14  ;;  %v1028_v12 = vpack.c.bf16 %v1564_v54, %v1560_v20  ;;  %1117 = vmatpush1.bf16.msra.mxu1 %v1026_v42  ;;  %v406_v14 = vld [vmem:[%s1912_s8 + $0x20] sm:$0xff]  ;;  %v1474_v42 = vld [vmem:[%s1912_s8 + $0x10] ss:$8 sps:$4 sm:$0xff]  }
 0x21f   : > { %v1568_v2 = vpop.eup %1567  ;;  %1587 = vpow2.f32 %v988_v23  ;;  %v1029_v11 = vpack.c.bf16 %v1566_v0, %v1562_v18  ;;  %v1433_v20 = vcombine.high %v406_v14, %v406_v14  ;;  %v1432_v43 = vcombine.low %v406_v14, %v406_v14  ;;  %v2480_v23 = vld [vmem:[#allocation33_spill] sm:$0xff] }
 0x220   : > { %v1570_v32 = vpop.eup %1569  ;;  %1589 = vpow2.f32 %v990_v27  ;;  %v2483_v27 = vld [vmem:[#allocation32_spill] sm:$0xff] }
 0x221   : > { %v1572_v13 = vpop.eup %1571  ;;  %1591 = vpow2.f32 %v992_v51  ;;  %1118 = vmatprep.subr.bf16.mxu1 %v1029_v11 }
 0x222   : > { %v1574_v10 = vpop.eup %1573  ;;  %1593 = vpow2.f32 %v994_v29  ;;  %v1030_v15 = vpack.c.bf16 %v1572_v13, %v1568_v2  ;;  %1119 = vmatpush1.bf16.msra.mxu1 %v1028_v12 }
 0x223   : > { %v1576_v57 = vpop.eup %1575  ;;  %1595 = vpow2.f32 %v996_v28  ;;  %v1031_v30 = vpack.c.bf16 %v1574_v10, %v1570_v32 }
 0x224   : > { %v1578_v59 = vpop.eup %1577  ;;  %1597 = vpow2.f32 %v998_v55 }
 0x225   : > { %v1580_v50 = vpop.eup %1579  ;;  %1599 = vpow2.f32 %v1000_v35  ;;  %1120 = vmatprep.subr.bf16.mxu1 %v1031_v30 }
 0x226   : > { %v1582_v40 = vpop.eup %1581  ;;  %1601 = vpow2.f32 %v1002_v36  ;;  %v1032_v39 = vpack.c.bf16 %v1580_v50, %v1576_v57  ;;  %1121 = vmatpush1.bf16.msra.mxu1 %v1030_v15  ;;  %v1226_v50 = vstv %s1217_s9 }
 0x227   : > { %v1584_v19 = vpop.eup %1583  ;;  %1603 = vpow2.f32 %v1004_v17  ;;  %v1033_v58 = vpack.c.bf16 %v1582_v40, %v1578_v59  ;;  %v1218_v40 = vld [vmem:[%s338_s13] sm:$0xff] }
 0x228   : > { %v1586_v33 = vpop.eup %1585 }
 0x229   : > { %v1588_v16 = vpop.eup %1587  ;;  %1122 = vmatprep.subr.bf16.mxu1 %v1033_v58 }
 0x22a   : > { %v1590_v61 = vpop.eup %1589  ;;  %v1034_v6 = vpack.c.bf16 %v1588_v16, %v1584_v19  ;;  %1123 = vmatpush1.bf16.msra.mxu1 %v1032_v39  ;;  %v1219_v39 = vld [vmem:[%s338_s13 + $0x8] sm:$0xff] }
 0x22b   : > { %v1592_v41 = vpop.eup %1591  ;;  %v1035_v21 = vpack.c.bf16 %v1590_v61, %v1586_v33  ;;  %v1220_v61 = vld [vmem:[%s338_s13 + $0x10] sm:$0xff] }
 0x22c   : > { %v1594_v56 = vpop.eup %1593 }
 0x22d   : > { %v1596_v22 = vpop.eup %1595  ;;  %1124 = vmatprep.subr.bf16.mxu1 %v1035_v21 }
 0x22e   : > { %v1598_v31 = vpop.eup %1597  ;;  %v1036_v63 = vpack.c.bf16 %v1596_v22, %v1592_v41  ;;  %1125 = vmatpush1.bf16.msra.mxu1 %v1034_v6  ;;  %v1221_v6 = vld [vmem:[%s338_s13 + $0x18] sm:$0xff]  ;;  %v1222_v41 = vld [vmem:[%s338_s13 + $0x20] sm:$0xff] }
 0x22f   : > { %v1600_v45 = vpop.eup %1599  ;;  %v1037_v34 = vpack.c.bf16 %v1598_v31, %v1594_v56 }
 0x230   : > { %v1602_v24 = vpop.eup %1601 }
 0x231   : > { %v1604_v52 = vpop.eup %1603  ;;  %v1039_v1 = vpack.c.bf16 %v2104_v60, %v1602_v24  ;;  %1126 = vmatprep.subr.bf16.mxu1 %v1037_v34  ;;  %v2481_v60 = vsub.f32 %v2479_v46, %v2480_v23  ;;  %v1225_v34 = vld [vmem:[%s338_s13 + $0x38] sm:$0xff] }
 0x232   : > { %v1038_v38 = vpack.c.bf16 %v1604_v52, %v1600_v45  ;;  %1127 = vmatpush1.bf16.msra.mxu1 %v1036_v63  ;;  %v1223_v63 = vld [vmem:[%s338_s13 + $0x28] sm:$0xff]  ;;  %v1224_v45 = vld [vmem:[%s338_s13 + $0x30] sm:$0xff] }
 0x233   : > { %1128 = vmatprep.subr.bf16.mxu1 %v1039_v1  ;;  %v803_v47 = vmul.f32 1.442695, %v2481_v60 }
 0x235   : > { %1605 = vpow2.f32 %v803_v47 }
 0x236   : > { %1129 = vmatpush1.bf16.msra.mxu1 %v1038_v38 }
 0x239   : > { %1131 = vmatmul.mubr.bf16.vlgmr.msra.gmra.mrb[0].mxu1 %v1469_v25 }
 0x23a   : > { %1140 = vmatprep.mubr.bf16.mxu1 %v1472_v3 }
 0x23f   : > { %v1606_v18 = vpop.eup %1605 }
 0x240   : > { %v1054_v49 = vrot.slane %v1606_v18, %v2482_v5  ;;  %v1058_v54 = vrot.slane %v1606_v18, %v2483_v27 }
 0x241   : > { %1141 = vmatmul.mubr.bf16.gmra.mrb[4].mxu1 %v1474_v42 }
 0x242   : > { %1150 = vmatprep.mubr.bf16.mxu1 %v1433_v20  ;;  %v1061_v7 = vmul.f32 0.0, %v1054_v49  ;;  %v1062_v51 = vmul.f32 0.0, %v1058_v54 }
 0x249   : > { %1151 = vmatmul.mubr.bf16.gmra.mrb[8].mxu1 %v1432_v43 }
 0x30c   : > { %v1132_v62 = vpop.f32.mrb[0].mxu1 }
 0x30d   : > { %v1159_v0 = vadd.f32 %v1132_v62, %v1061_v7  ;;  %v1134_v9 = vpop.f32.mrb[1].mxu1 }
 0x30e   : > { %v1160_v29 = vadd.f32 %v1134_v9, %v1062_v51  ;;  %v1136_v12 = vpop.f32.mrb[2].mxu1 }
 0x30f   : > { %v1161_v2 = vadd.f32 %v1136_v12, %v1061_v7  ;;  %v1138_v53 = vpop.f32.mrb[3].mxu1 }
 0x310   : > { %v1162_v28 = vadd.f32 %v1138_v53, %v1062_v51 }
 0x314   : > { %v1142_v11 = vpop.f32.mrb[4].mxu1 }
 0x315   : > { %v1163_v32 = vadd.f32 %v1142_v11, %v1061_v7  ;;  %v1144_v4 = vpop.f32.mrb[5].mxu1 }
 0x316   : > { %v1164_v8 = vadd.f32 %v1144_v4, %v1062_v51  ;;  %v1146_v55 = vpop.f32.mrb[6].mxu1 }
 0x317   : > { %v1165_v13 = vadd.f32 %v1146_v55, %v1061_v7  ;;  %v1148_v44 = vpop.f32.mrb[7].mxu1 }
 0x318   : > { %v1166_v35 = vadd.f32 %v1148_v44, %v1062_v51 }
 0x31c   : > { %v1152_v10 = vpop.f32.mrb[8].mxu1 }
 0x31d   : > { %v1167_v26 = vadd.f32 %v1152_v10, %v1061_v7  ;;  %v1154_v36 = vpop.f32.mrb[9].mxu1 }
 0x31e   : > { %v1168_v15 = vadd.f32 %v1154_v36, %v1062_v51  ;;  %v1156_v57 = vpop.f32.mrb[10].mxu1 }
 0x31f   : > { %1177 = vst [vmem:[#allocation3 + $0x40] sm:$0xff] %v1167_v26  ;;  %v1157_v48 = vpop.f32.mrb[11].mxu1 }
 0x320   : > { %1178 = vst [vmem:[#allocation3 + $0x48] sm:$0xff] %v1168_v15 }
 0x327   : > { %v1196_v37 = vld [vmem:[#allocation3 + $0x40] ss:$8 sm:$0x3] }
 0x328   : > { %1607 = vrcp.f32 %v1196_v37 }
 0x332   : > { %v1608_v17 = vpop.eup %1607 }
 0x333   : > { %v1202_v30 = vrot.slane %v1608_v17, %v2482_v5  ;;  %v1206_v59 = vrot.slane %v1608_v17, %v2483_v27 }
 0x335   : > { %v1209_v19 = vmul.f32 %v1202_v30, %v1159_v0  ;;  %v1210_v58 = vmul.f32 %v1206_v59, %v1160_v29  ;;  %v1211_v33 = vmul.f32 %v1202_v30, %v1161_v2  ;;  %v1212_v16 = vmul.f32 %v1206_v59, %v1162_v28 }
 0x336   : > { %v1213_v21 = vmul.f32 %v1202_v30, %v1163_v32  ;;  %v1214_v56 = vmul.f32 %v1206_v59, %v1164_v8  ;;  %v1215_v22 = vmul.f32 %v1202_v30, %v1165_v13  ;;  %v1216_v31 = vmul.f32 %v1206_v59, %v1166_v35 }
 0x337   : > { %v1227_v24 = vmul.f32 %v1226_v50, %v1209_v19  ;;  %v1228_v52 = vmul.f32 %v1226_v50, %v1210_v58  ;;  %v1229_v1 = vmul.f32 %v1226_v50, %v1211_v33  ;;  %v1230_v38 = vmul.f32 %v1226_v50, %v1212_v16 }
 0x338   : > { %v1231_v25 = vmul.f32 %v1226_v50, %v1213_v21  ;;  %v1232_v3 = vmul.f32 %v1226_v50, %v1214_v56  ;;  %v1233_v14 = vmul.f32 %v1226_v50, %v1215_v22  ;;  %v1234_v42 = vmul.f32 %v1226_v50, %v1216_v31 }
 0x339   : > { %v1235_v20 = vadd.f32 %v1227_v24, %v1218_v40  ;;  %v1236_v43 = vadd.f32 %v1228_v52, %v1219_v39  ;;  %v1237_v46 = vadd.f32 %v1229_v1, %v1220_v61  ;;  %v1238_v23 = vadd.f32 %v1230_v38, %v1221_v6 }
 0x33a   : > { %v1239_v60 = vadd.f32 %v1231_v25, %v1222_v41  ;;  %v1240_v47 = vadd.f32 %v1232_v3, %v1223_v63  ;;  %v1241_v18 = vadd.f32 %v1233_v14, %v1224_v45  ;;  %v1242_v5 = vadd.f32 %v1234_v42, %v1225_v34 }
 0x33b   : > { %1243 = vst [vmem:[%s378_s16] sm:$0xff] %v1235_v20  ;;  %1244 = vst [vmem:[%s378_s16 + $0x8] sm:$0xff] %v1236_v43 }
 0x33c   : > { %1245 = vst [vmem:[%s378_s16 + $0x10] sm:$0xff] %v1237_v46  ;;  %1246 = vst [vmem:[%s378_s16 + $0x18] sm:$0xff] %v1238_v23 }
 0x33d   : > { %1247 = vst [vmem:[%s378_s16 + $0x20] sm:$0xff] %v1239_v60  ;;  %1248 = vst [vmem:[%s378_s16 + $0x28] sm:$0xff] %v1240_v47 }
 0x33e   : > { %1249 = vst [vmem:[%s378_s16 + $0x30] sm:$0xff] %v1241_v18  ;;  %1250 = vst [vmem:[%s378_s16 + $0x38] sm:$0xff] %v1242_v5 }
 0x33f PF: > { %s16_s22 = sadd.s32 1, %s1631_s22   ;;  %s2484_s20 = smov %s1627_s21 }
 0x340   : > { %p13_p5 = scmp.ge.s32.totalorder %s16_s22, 4   ;;  %s2485_s21 = smov %s2487_s4 }
 0x342   :  { %15 = sbr.rel (!%p13_p5) target bundleno = 2 (0x2), region = 88 }

</bundles_post_ra>
